<compile_context>
chip_gen: v7x
topology: tpu7x:2x2x1
jax: 0.10.0
libtpu: 0.0.40
codegen_flags: <defaults>
</compile_context>

<pallas_src>
import math
import functools

import jax
import jax.numpy as jnp
from jax.experimental import pallas as pl
from jax.experimental.pallas import tpu as pltpu


def _round_up(x, m):
    return ((x + m - 1) // m) * m


def _detr_attention_kernel(*refs, num_heads, head_dim, scaling,
                           has_mask, mask_heads):
    if has_mask:
        (hqq_ref, hqf_ref, hsv_ref, mask_ref,
         wq_ref, wk_ref, wv_ref, wo_ref,
         bq_ref, bk_ref, bv_ref, bo_ref,
         out_ref, ctx_ref) = refs
    else:
        (hqq_ref, hqf_ref, hsv_ref,
         wq_ref, wk_ref, wv_ref, wo_ref,
         bq_ref, bk_ref, bv_ref, bo_ref,
         out_ref, ctx_ref) = refs
        mask_ref = None

    f32 = jnp.float32
    cdt = wq_ref.dtype                       # compute dtype (bf16 or f32)

    # ---- Q projection: current query tile only (TQ, E) --------------------
    q = jnp.dot(hqq_ref[0], wq_ref[...], preferred_element_type=f32) + bq_ref[...]
    q = (q * scaling).astype(cdt)

    # ---- K / V projections over the full (unpadded) sequence --------------
    # hqf/hsv blocks have a constant index_map along the query-tile axis, so
    # they are DMA'd once per batch element; the re-projection per tile hides
    # under the softmax EUP/VPU work and keeps both grid axes "parallel".
    k = (jnp.dot(hqf_ref[0], wk_ref[...], preferred_element_type=f32)
         + bk_ref[...]).astype(cdt)          # (L, E)
    v = (jnp.dot(hsv_ref[0], wv_ref[...], preferred_element_type=f32)
         + bv_ref[...]).astype(cdt)          # (L, E)

    if has_mask and mask_heads == 1:
        mask_shared = mask_ref[0, 0]         # hoisted (TQ, L) load

    # ---- per-head attention, context written into a VMEM scratch slab -----
    for h in range(num_heads):               # static unroll; static lane slices
        lo = h * head_dim
        qh = q[:, lo:lo + head_dim]          # (TQ, Dh)
        kh = k[:, lo:lo + head_dim]          # (L,  Dh)
        vh = v[:, lo:lo + head_dim]          # (L,  Dh)

        # logits = qh @ kh^T without materializing the transpose.
        logits = jax.lax.dot_general(
            qh, kh, (((1,), (1,)), ((), ())),
            preferred_element_type=f32)      # (TQ, L) f32

        if has_mask:
            logits = logits + (mask_shared if mask_heads == 1
                               else mask_ref[0, h])

        # Numerically stable softmax statistics in f32 (like the module).
        row_max = jnp.max(logits, axis=-1, keepdims=True)
        # Guard fully -inf rows (avoid NaN from -inf - -inf); finite masks
        # (the HF convention) are untouched.
        row_max = jnp.where(row_max == -jnp.inf, 0.0, row_max)
        e = jnp.exp(logits - row_max)
        denom = jnp.sum(e, axis=-1, keepdims=True)

        # Fold the normalization past the PV matmul (exact, per-row scalar):
        # divide touches (TQ, Dh) elements instead of (TQ, L).
        ctx_ref[:, lo:lo + head_dim] = (
            jnp.dot(e.astype(cdt), vh, preferred_element_type=f32)
            * (1.0 / denom))
        # TODO(synk): training-mode attention_dropout is not implemented
        # (eval-mode no-op matches the reference).

    # ---- single K=E output projection --------------------------------------
    out = jnp.dot(ctx_ref[...].astype(cdt), wo_ref[...],
                  preferred_element_type=f32) + bo_ref[...]
    out_ref[0] = out.astype(out_ref.dtype)


def detr_attention(hidden_states,
                   q_w, q_b, k_w, k_b, v_w, v_b, o_w, o_b,
                   *,
                   num_heads,
                   attention_mask=None,
                   object_queries=None,
                   key_value_states=None,
                   output_attentions=False,
                   compute_dtype=jnp.bfloat16,
                   q_tile=None):
    """Pallas equivalent of DetrAttention.forward (eval / self-attention).

    hidden_states:  (B, L, E)
    q_w/k_w/v_w/o_w: (E, E) in PyTorch (out_features, in_features) layout.
    q_b/k_b/v_b/o_b: (E,)
    attention_mask: None, (B, 1, L, L) or (B, num_heads, L, L) additive mask.
    object_queries: (B, L, E) positional embeddings added to Q/K (not V).
    compute_dtype:  matmul input dtype (bf16 default; f32 accumulation).
    Returns (attn_output, None) -- attn_output: (B, L, E).
    """
    del key_value_states  # accepted but unused by the PyTorch forward body
    B, L, E = hidden_states.shape
    if E % num_heads != 0:
        raise ValueError("hidden_size must be divisible by num_heads")
    head_dim = E // num_heads
    scaling = float(head_dim) ** -0.5

    f32 = jnp.float32
    cdt = jnp.dtype(compute_dtype)

    hs = hidden_states.astype(f32)
    # Q/K see positions; V does not (DETR). object_queries=None -> no positions.
    hq = hs if object_queries is None else hs + object_queries.astype(f32)

    # ---- query-tile geometry (pad only the query dimension) ----------------
    if q_tile is None:
        q_tile = min(128, _round_up(L, 8))
    q_tile = max(8, _round_up(min(q_tile, _round_up(L, 8)), 8))
    L_pad = _round_up(L, q_tile)
    nq = L_pad // q_tile
    pad = L_pad - L

    hq_q = hq if pad == 0 else jnp.pad(hq, ((0, 0), (0, pad), (0, 0)))
    hq_q = hq_q.astype(cdt)          # query-side (B, L_pad, E)
    hq_kv = hq.astype(cdt)           # key-side full sequence (B, L, E)
    hs_v = hs.astype(cdt)            # value-side full sequence (B, L, E)

    # Host-side constant folding: (out, in) -> (in, out); biases -> (1, E) f32.
    wq_t = jnp.transpose(q_w).astype(cdt)
    wk_t = jnp.transpose(k_w).astype(cdt)
    wv_t = jnp.transpose(v_w).astype(cdt)
    wo_t = jnp.transpose(o_w).astype(cdt)
    bq = q_b.astype(f32).reshape(1, E)
    bk = k_b.astype(f32).reshape(1, E)
    bv = v_b.astype(f32).reshape(1, E)
    bo = o_b.astype(f32).reshape(1, E)

    has_mask = attention_mask is not None
    mask_heads = 1
    mask = None
    if has_mask:
        mask = attention_mask.astype(f32)
        if mask.ndim != 4 or mask.shape[0] != B or mask.shape[2:] != (L, L):
            raise ValueError(f"bad attention_mask shape {mask.shape}")
        mask_heads = mask.shape[1]
        if mask_heads not in (1, num_heads):
            raise ValueError("attention_mask head dim must be 1 or num_heads")
        if pad:
            mask = jnp.pad(mask, ((0, 0), (0, 0), (0, pad), (0, 0)))

    kernel = functools.partial(
        _detr_attention_kernel,
        num_heads=num_heads, head_dim=head_dim, scaling=scaling,
        has_mask=has_mask, mask_heads=mask_heads)

    # ---- BlockSpecs ---------------------------------------------------------
    # Query-side activations + mask + output are tiled per (batch, query-tile);
    # key/value-side activations and all weights/biases use constant index maps
    # so Pallas keeps them resident in VMEM across query-tile steps.
    qact_spec = pl.BlockSpec((1, q_tile, E), lambda b, q: (b, q, 0))
    full_spec = pl.BlockSpec((1, L, E), lambda b, q: (b, 0, 0))
    w_spec = pl.BlockSpec((E, E), lambda b, q: (0, 0))
    b_spec = pl.BlockSpec((1, E), lambda b, q: (0, 0))

    in_specs = [qact_spec, full_spec, full_spec]
    args = [hq_q, hq_kv, hs_v]
    if has_mask:
        in_specs.append(pl.BlockSpec((1, mask_heads, q_tile, L),
                                     lambda b, q: (b, 0, q, 0)))
        args.append(mask)
    in_specs += [w_spec, w_spec, w_spec, w_spec, b_spec, b_spec, b_spec, b_spec]
    args += [wq_t, wk_t, wv_t, wo_t, bq, bk, bv, bo]

    # ---- VMEM budget (resident weights + 2x-buffered tiles + temporaries) --
    cdt_size = cdt.itemsize
    out_size = jnp.dtype(hidden_states.dtype).itemsize
    est = (
        2 * (4 * E * E * cdt_size + 4 * E * 4)              # weights / biases
        + 2 * q_tile * E * cdt_size                         # query-tile block
        + 2 * 2 * L * E * cdt_size                          # hq_kv + hs_v blocks
        + (2 * mask_heads * q_tile * L * 4 if has_mask else 0)
        + 2 * q_tile * E * out_size                         # output block
        + q_tile * E * 4                                    # ctx scratch slab
        + q_tile * E * 4 + 2 * L * E * (4 + cdt_size)       # q/k/v temporaries
        + 3 * q_tile * L * 4                                # logits/exp temps
    )
    vmem_limit = int(min(max(2 * est, 16 * 1024 * 1024), 48 * 1024 * 1024))

    # ---- advisory cost estimate --------------------------------------------
    flops = int(B * nq * (4 * q_tile * E * E        # Q + out projections
                          + 4 * L * E * E           # K/V projections per tile
                          + 4 * q_tile * L * E))    # QK^T + PV
    transcendentals = int(B * nq * num_heads * q_tile * L)
    bytes_accessed = int(
        B * L_pad * E * cdt_size                    # query-side activations
        + 2 * B * L * E * cdt_size                  # key/value-side activations
        + (B * mask_heads * L_pad * L * 4 if has_mask else 0)
        + 4 * E * E * cdt_size + 4 * E * 4          # weights + biases
        + B * L_pad * E * out_size)                 # output

    out_padded = pl.pallas_call(
        kernel,
        out_shape=jax.ShapeDtypeStruct((B, L_pad, E), hidden_states.dtype),
        grid=(B, nq),
        in_specs=in_specs,
        out_specs=pl.BlockSpec((1, q_tile, E), lambda b, q: (b, q, 0)),
        scratch_shapes=[pltpu.VMEM((q_tile, E), jnp.float32)],
        compiler_params=pltpu.CompilerParams(
            dimension_semantics=("parallel", "parallel"),
            vmem_limit_bytes=vmem_limit),
        cost_estimate=pl.CostEstimate(
            flops=flops,
            transcendentals=transcendentals,
            bytes_accessed=bytes_accessed),
    )(*args)

    attn_output = out_padded if pad == 0 else out_padded[:, :L, :]
    # TODO(synk): output_attentions=True (returning softmax weights) is not
    # emitted; the module returns None for them by default.
    return attn_output, None


def _reference(hs, oq, mask, q_w, q_b, k_w, k_b, v_w, v_b, o_w, o_b,
               num_heads, compute_dtype):
    """Pure-JAX transcription of the PyTorch forward (mixed-precision aware)."""
    B, L, E = hs.shape
    Dh = E // num_heads
    scaling = float(Dh) ** -0.5
    f32 = jnp.float32
    cdt = jnp.dtype(compute_dtype)

    hs = hs.astype(f32)
    hq = hs if oq is None else hs + oq.astype(f32)

    def proj(x, w, b):
        return jnp.dot(x.astype(cdt), jnp.transpose(w).astype(cdt),
                       preferred_element_type=f32) + b

    q = (proj(hq, q_w, q_b) * scaling).astype(cdt)
    k = proj(hq, k_w, k_b).astype(cdt)
    v = proj(hs, v_w, v_b).astype(cdt)

    def split(x):
        return x.reshape(B, L, num_heads, Dh).transpose(0, 2, 1, 3)

    qh, kh, vh = split(q), split(k), split(v)
    logits = jnp.einsum("bhqd,bhkd->bhqk", qh, kh, preferred_element_type=f32)
    if mask is not None:
        logits = logits + mask.astype(f32)
    p = jax.nn.softmax(logits, axis=-1)
    ctx = jnp.einsum("bhqk,bhkd->bhqd", p.astype(cdt), vh,
                     preferred_element_type=f32)
    ctx = ctx.transpose(0, 2, 1, 3).reshape(B, L, E)
    return jnp.dot(ctx.astype(cdt), jnp.transpose(o_w).astype(cdt),
                   preferred_element_type=f32) + o_b


if __name__ == "__main__":
    B, L, HIDDEN, NUM_HEADS = 2, 8, 32, 4

    key = jax.random.PRNGKey(0)
    keys = jax.random.split(key, 10)
    w_scale = 1.0 / math.sqrt(HIDDEN)

    hidden_states = jax.random.normal(keys[0], (B, L, HIDDEN), dtype=jnp.float32)
    object_queries = jax.random.normal(keys[1], (B, L, HIDDEN), dtype=jnp.float32)

    q_w = jax.random.normal(keys[2], (HIDDEN, HIDDEN), dtype=jnp.float32) * w_scale
    k_w = jax.random.normal(keys[3], (HIDDEN, HIDDEN), dtype=jnp.float32) * w_scale
    v_w = jax.random.normal(keys[4], (HIDDEN, HIDDEN), dtype=jnp.float32) * w_scale
    o_w = jax.random.normal(keys[5], (HIDDEN, HIDDEN), dtype=jnp.float32) * w_scale
    q_b = jax.random.normal(keys[6], (HIDDEN,), dtype=jnp.float32) * 0.1
    k_b = jax.random.normal(keys[7], (HIDDEN,), dtype=jnp.float32) * 0.1
    v_b = jax.random.normal(keys[8], (HIDDEN,), dtype=jnp.float32) * 0.1
    o_b = jax.random.normal(keys[9], (HIDDEN,), dtype=jnp.float32) * 0.1

    # Additive attention mask: batch 1 cannot attend to its last two keys.
    attention_mask = jnp.zeros((B, 1, L, L), dtype=jnp.float32)
    attention_mask = attention_mask.at[1, :, :, L - 2:].set(-1e9)

    weights = (q_w, q_b, k_w, k_b, v_w, v_b, o_w, o_b)

    # Exact f32 path (tight tolerance against the PyTorch-equivalent reference).
    out_f32, attn_w = detr_attention(
        hidden_states, *weights, num_heads=NUM_HEADS,
        attention_mask=attention_mask, object_queries=object_queries,
        compute_dtype=jnp.float32)

    # Default mixed-precision path (bf16 MXU inputs, f32 accumulation).
    out_bf16, _ = detr_attention(
        hidden_states, *weights, num_heads=NUM_HEADS,
        attention_mask=attention_mask, object_queries=object_queries)

    # No-mask path (exercises the other kernel specialization).
    out_nomask, _ = detr_attention(
        hidden_states, *weights, num_heads=NUM_HEADS,
        attention_mask=None, object_queries=object_queries,
        compute_dtype=jnp.float32)

    jax.block_until_ready((out_f32, out_bf16, out_nomask))

    ref_f32 = _reference(hidden_states, object_queries, attention_mask,
                         *weights, NUM_HEADS, jnp.float32)
    ref_bf16 = _reference(hidden_states, object_queries, attention_mask,
                          *weights, NUM_HEADS, jnp.bfloat16)
    ref_nomask = _reference(hidden_states, object_queries, None,
                            *weights, NUM_HEADS, jnp.float32)

    assert out_f32.shape == (B, L, HIDDEN), out_f32.shape
    assert out_f32.dtype == jnp.float32
    assert out_bf16.shape == (B, L, HIDDEN), out_bf16.shape
    assert attn_w is None

    err_f32 = float(jnp.max(jnp.abs(out_f32 - ref_f32)))
    err_bf16 = float(jnp.max(jnp.abs(out_bf16 - ref_bf16)))
    err_nm = float(jnp.max(jnp.abs(out_nomask - ref_nomask)))
    assert jnp.allclose(out_f32, ref_f32, atol=2e-3, rtol=2e-3), err_f32
    assert jnp.allclose(out_nomask, ref_nomask, atol=2e-3, rtol=2e-3), err_nm
    assert jnp.allclose(out_bf16, ref_bf16, atol=5e-2, rtol=5e-2), err_bf16

    print("KERNEL_OK")
</pallas_src>

<mosaic_0001>
module attributes {stable_mosaic.version = 11 : i64} {
  func.func @_detr_attention_kernel(%arg0: i32, %arg1: i32, %arg2: memref<1x8x32xf32, #tpu.memory_space<vmem>>, %arg3: memref<1x8x32xf32, #tpu.memory_space<vmem>>, %arg4: memref<1x8x32xf32, #tpu.memory_space<vmem>>, %arg5: memref<1x1x8x8xf32, #tpu.memory_space<vmem>>, %arg6: memref<32x32xf32, #tpu.memory_space<vmem>>, %arg7: memref<32x32xf32, #tpu.memory_space<vmem>>, %arg8: memref<32x32xf32, #tpu.memory_space<vmem>>, %arg9: memref<32x32xf32, #tpu.memory_space<vmem>>, %arg10: memref<1x32xf32, #tpu.memory_space<vmem>>, %arg11: memref<1x32xf32, #tpu.memory_space<vmem>>, %arg12: memref<1x32xf32, #tpu.memory_space<vmem>>, %arg13: memref<1x32xf32, #tpu.memory_space<vmem>>, %arg14: memref<1x8x32xf32, #tpu.memory_space<vmem>>, %arg15: memref<8x32xf32, #tpu.memory_space<vmem>>) attributes {dimension_semantics = [#tpu.dimension_semantics<parallel>, #tpu.dimension_semantics<parallel>], iteration_bounds = array<i64: 2, 1>, scalar_prefetch = 0 : i64, scratch_operands = 1 : i64, tpu.core_type = #tpu.core_type<tc>, window_params = [{transform_indices = @transform_0, window_bounds = array<i64: 1, 8, 32>}, {transform_indices = @transform_1, window_bounds = array<i64: 1, 8, 32>}, {transform_indices = @transform_2, window_bounds = array<i64: 1, 8, 32>}, {transform_indices = @transform_3, window_bounds = array<i64: 1, 1, 8, 8>}, {pipeline_mode = #tpu.pipeline_mode<synchronous>, transform_indices = @transform_4, window_bounds = array<i64: 32, 32>}, {pipeline_mode = #tpu.pipeline_mode<synchronous>, transform_indices = @transform_5, window_bounds = array<i64: 32, 32>}, {pipeline_mode = #tpu.pipeline_mode<synchronous>, transform_indices = @transform_6, window_bounds = array<i64: 32, 32>}, {pipeline_mode = #tpu.pipeline_mode<synchronous>, transform_indices = @transform_7, window_bounds = array<i64: 32, 32>}, {pipeline_mode = #tpu.pipeline_mode<synchronous>, transform_indices = @transform_8, window_bounds = array<i64: 1, 32>}, {pipeline_mode = #tpu.pipeline_mode<synchronous>, transform_indices = @transform_9, window_bounds = array<i64: 1, 32>}, {pipeline_mode = #tpu.pipeline_mode<synchronous>, transform_indices = @transform_10, window_bounds = array<i64: 1, 32>}, {pipeline_mode = #tpu.pipeline_mode<synchronous>, transform_indices = @transform_11, window_bounds = array<i64: 1, 32>}, {transform_indices = @transform_12, window_bounds = array<i64: 1, 8, 32>}]} {
    %c0 = arith.constant 0 : index
    %c0_0 = arith.constant 0 : index
    %c0_1 = arith.constant 0 : index
    %0 = vector.load %arg2[%c0, %c0_0, %c0_1] : memref<1x8x32xf32, #tpu.memory_space<vmem>>, vector<1x8x32xf32>
    %1 = vector.shape_cast %0 : vector<1x8x32xf32> to vector<8x32xf32>
    %c0_2 = arith.constant 0 : index
    %c0_3 = arith.constant 0 : index
    %2 = vector.load %arg6[%c0_2, %c0_3] : memref<32x32xf32, #tpu.memory_space<vmem>>, vector<32x32xf32>
    %cst = arith.constant dense<0.000000e+00> : vector<8x32xf32>
    %3 = tpu.matmul %1, %2, %cst {dimension_numbers = #tpu.dot_dimension_numbers<[1], [0], [0], [1], [0, 0, 1, 1], [], []>} : vector<8x32xf32>, vector<32x32xf32>, vector<8x32xf32> -> vector<8x32xf32>
    %c0_4 = arith.constant 0 : index
    %c0_5 = arith.constant 0 : index
    %4 = vector.load %arg10[%c0_4, %c0_5] : memref<1x32xf32, #tpu.memory_space<vmem>>, vector<1x32xf32>
    %5 = vector.broadcast %4 : vector<1x32xf32> to vector<8x32xf32>
    %6 = arith.addf %3, %5 : vector<8x32xf32>
    %cst_6 = arith.constant 0.353553385 : f32
    %7 = vector.broadcast %cst_6 : f32 to vector<8x32xf32>
    %8 = arith.mulf %6, %7 : vector<8x32xf32>
    %c0_7 = arith.constant 0 : index
    %c0_8 = arith.constant 0 : index
    %c0_9 = arith.constant 0 : index
    %9 = vector.load %arg3[%c0_7, %c0_8, %c0_9] : memref<1x8x32xf32, #tpu.memory_space<vmem>>, vector<1x8x32xf32>
    %10 = vector.shape_cast %9 : vector<1x8x32xf32> to vector<8x32xf32>
    %c0_10 = arith.constant 0 : index
    %c0_11 = arith.constant 0 : index
    %11 = vector.load %arg7[%c0_10, %c0_11] : memref<32x32xf32, #tpu.memory_space<vmem>>, vector<32x32xf32>
    %cst_12 = arith.constant dense<0.000000e+00> : vector<8x32xf32>
    %12 = tpu.matmul %10, %11, %cst_12 {dimension_numbers = #tpu.dot_dimension_numbers<[1], [0], [0], [1], [0, 0, 1, 1], [], []>} : vector<8x32xf32>, vector<32x32xf32>, vector<8x32xf32> -> vector<8x32xf32>
    %c0_13 = arith.constant 0 : index
    %c0_14 = arith.constant 0 : index
    %13 = vector.load %arg11[%c0_13, %c0_14] : memref<1x32xf32, #tpu.memory_space<vmem>>, vector<1x32xf32>
    %14 = vector.broadcast %13 : vector<1x32xf32> to vector<8x32xf32>
    %15 = arith.addf %12, %14 : vector<8x32xf32>
    %c0_15 = arith.constant 0 : index
    %c0_16 = arith.constant 0 : index
    %c0_17 = arith.constant 0 : index
    %16 = vector.load %arg4[%c0_15, %c0_16, %c0_17] : memref<1x8x32xf32, #tpu.memory_space<vmem>>, vector<1x8x32xf32>
    %17 = vector.shape_cast %16 : vector<1x8x32xf32> to vector<8x32xf32>
    %c0_18 = arith.constant 0 : index
    %c0_19 = arith.constant 0 : index
    %18 = vector.load %arg8[%c0_18, %c0_19] : memref<32x32xf32, #tpu.memory_space<vmem>>, vector<32x32xf32>
    %cst_20 = arith.constant dense<0.000000e+00> : vector<8x32xf32>
    %19 = tpu.matmul %17, %18, %cst_20 {dimension_numbers = #tpu.dot_dimension_numbers<[1], [0], [0], [1], [0, 0, 1, 1], [], []>} : vector<8x32xf32>, vector<32x32xf32>, vector<8x32xf32> -> vector<8x32xf32>
    %c0_21 = arith.constant 0 : index
    %c0_22 = arith.constant 0 : index
    %20 = vector.load %arg12[%c0_21, %c0_22] : memref<1x32xf32, #tpu.memory_space<vmem>>, vector<1x32xf32>
    %21 = vector.broadcast %20 : vector<1x32xf32> to vector<8x32xf32>
    %22 = arith.addf %19, %21 : vector<8x32xf32>
    %c0_23 = arith.constant 0 : index
    %c0_24 = arith.constant 0 : index
    %c0_25 = arith.constant 0 : index
    %c0_26 = arith.constant 0 : index
    %23 = vector.load %arg5[%c0_23, %c0_24, %c0_25, %c0_26] : memref<1x1x8x8xf32, #tpu.memory_space<vmem>>, vector<1x1x8x8xf32>
    %24 = vector.shape_cast %23 : vector<1x1x8x8xf32> to vector<8x8xf32>
    %25 = vector.extract_strided_slice %8 {offsets = [0, 0], sizes = [8, 8], strides = [1, 1]} : vector<8x32xf32> to vector<8x8xf32>
    %26 = vector.extract_strided_slice %15 {offsets = [0, 0], sizes = [8, 8], strides = [1, 1]} : vector<8x32xf32> to vector<8x8xf32>
    %27 = vector.extract_strided_slice %22 {offsets = [0, 0], sizes = [8, 8], strides = [1, 1]} : vector<8x32xf32> to vector<8x8xf32>
    %cst_27 = arith.constant dense<0.000000e+00> : vector<8x8xf32>
    %28 = tpu.matmul %25, %26, %cst_27 {dimension_numbers = #tpu.dot_dimension_numbers<[1], [1], [0], [0], [0, 0, 1, 0], [], []>} : vector<8x8xf32>, vector<8x8xf32>, vector<8x8xf32> -> vector<8x8xf32>
    %29 = arith.addf %28, %24 : vector<8x8xf32>
    %cst_28 = arith.constant dense<0xFF800000> : vector<8xf32>
    %30 = vector.multi_reduction <maximumf>, %29, %cst_28 [1] : vector<8x8xf32> to vector<8xf32>
    %31 = vector.shape_cast %30 : vector<8xf32> to vector<8x1xf32>
    %cst_29 = arith.constant 0xFF800000 : f32
    %32 = vector.broadcast %cst_29 : f32 to vector<8x1xf32>
    %33 = arith.cmpf oeq, %31, %32 : vector<8x1xf32>
    %cst_30 = arith.constant 0.000000e+00 : f32
    %34 = vector.broadcast %cst_30 : f32 to vector<8x1xf32>
    %35 = arith.select %33, %34, %31 : vector<8x1xi1>, vector<8x1xf32>
    %36 = vector.broadcast %35 : vector<8x1xf32> to vector<8x8xf32>
    %37 = arith.subf %29, %36 : vector<8x8xf32>
    %38 = math.exp %37 : vector<8x8xf32>
    %cst_31 = arith.constant dense<0.000000e+00> : vector<8xf32>
    %39 = vector.multi_reduction <add>, %38, %cst_31 [1] : vector<8x8xf32> to vector<8xf32>
    %40 = vector.shape_cast %39 : vector<8xf32> to vector<8x1xf32>
    %cst_32 = arith.constant dense<0.000000e+00> : vector<8x8xf32>
    %41 = tpu.matmul %38, %27, %cst_32 {dimension_numbers = #tpu.dot_dimension_numbers<[1], [0], [0], [1], [0, 0, 1, 1], [], []>} : vector<8x8xf32>, vector<8x8xf32>, vector<8x8xf32> -> vector<8x8xf32>
    %cst_33 = arith.constant 1.000000e+00 : f32
    %42 = vector.broadcast %cst_33 : f32 to vector<8x1xf32>
    %43 = arith.divf %42, %40 : vector<8x1xf32>
    %44 = vector.broadcast %43 : vector<8x1xf32> to vector<8x8xf32>
    %45 = arith.mulf %41, %44 : vector<8x8xf32>
    %c0_34 = arith.constant 0 : index
    %c0_35 = arith.constant 0 : index
    %46 = vector.load %arg15[%c0_34, %c0_35] : memref<8x32xf32, #tpu.memory_space<vmem>>, vector<8x8xf32>
    tpu.vector_store %arg15[%c0_34, %c0_35], %45 {strides = array<i32>} : memref<8x32xf32, #tpu.memory_space<vmem>>, vector<8x8xf32>,
    %47 = vector.extract_strided_slice %8 {offsets = [0, 8], sizes = [8, 8], strides = [1, 1]} : vector<8x32xf32> to vector<8x8xf32>
    %48 = vector.extract_strided_slice %15 {offsets = [0, 8], sizes = [8, 8], strides = [1, 1]} : vector<8x32xf32> to vector<8x8xf32>
    %49 = vector.extract_strided_slice %22 {offsets = [0, 8], sizes = [8, 8], strides = [1, 1]} : vector<8x32xf32> to vector<8x8xf32>
    %cst_36 = arith.constant dense<0.000000e+00> : vector<8x8xf32>
    %50 = tpu.matmul %47, %48, %cst_36 {dimension_numbers = #tpu.dot_dimension_numbers<[1], [1], [0], [0], [0, 0, 1, 0], [], []>} : vector<8x8xf32>, vector<8x8xf32>, vector<8x8xf32> -> vector<8x8xf32>
    %51 = arith.addf %50, %24 : vector<8x8xf32>
    %cst_37 = arith.constant dense<0xFF800000> : vector<8xf32>
    %52 = vector.multi_reduction <maximumf>, %51, %cst_37 [1] : vector<8x8xf32> to vector<8xf32>
    %53 = vector.shape_cast %52 : vector<8xf32> to vector<8x1xf32>
    %cst_38 = arith.constant 0xFF800000 : f32
    %54 = vector.broadcast %cst_38 : f32 to vector<8x1xf32>
    %55 = arith.cmpf oeq, %53, %54 : vector<8x1xf32>
    %cst_39 = arith.constant 0.000000e+00 : f32
    %56 = vector.broadcast %cst_39 : f32 to vector<8x1xf32>
    %57 = arith.select %55, %56, %53 : vector<8x1xi1>, vector<8x1xf32>
    %58 = vector.broadcast %57 : vector<8x1xf32> to vector<8x8xf32>
    %59 = arith.subf %51, %58 : vector<8x8xf32>
    %60 = math.exp %59 : vector<8x8xf32>
    %cst_40 = arith.constant dense<0.000000e+00> : vector<8xf32>
    %61 = vector.multi_reduction <add>, %60, %cst_40 [1] : vector<8x8xf32> to vector<8xf32>
    %62 = vector.shape_cast %61 : vector<8xf32> to vector<8x1xf32>
    %cst_41 = arith.constant dense<0.000000e+00> : vector<8x8xf32>
    %63 = tpu.matmul %60, %49, %cst_41 {dimension_numbers = #tpu.dot_dimension_numbers<[1], [0], [0], [1], [0, 0, 1, 1], [], []>} : vector<8x8xf32>, vector<8x8xf32>, vector<8x8xf32> -> vector<8x8xf32>
    %cst_42 = arith.constant 1.000000e+00 : f32
    %64 = vector.broadcast %cst_42 : f32 to vector<8x1xf32>
    %65 = arith.divf %64, %62 : vector<8x1xf32>
    %66 = vector.broadcast %65 : vector<8x1xf32> to vector<8x8xf32>
    %67 = arith.mulf %63, %66 : vector<8x8xf32>
    %c0_43 = arith.constant 0 : index
    %c8 = arith.constant 8 : index
    %68 = vector.load %arg15[%c0_43, %c8] : memref<8x32xf32, #tpu.memory_space<vmem>>, vector<8x8xf32>
    tpu.vector_store %arg15[%c0_43, %c8], %67 {strides = array<i32>} : memref<8x32xf32, #tpu.memory_space<vmem>>, vector<8x8xf32>,
    %69 = vector.extract_strided_slice %8 {offsets = [0, 16], sizes = [8, 8], strides = [1, 1]} : vector<8x32xf32> to vector<8x8xf32>
    %70 = vector.extract_strided_slice %15 {offsets = [0, 16], sizes = [8, 8], strides = [1, 1]} : vector<8x32xf32> to vector<8x8xf32>
    %71 = vector.extract_strided_slice %22 {offsets = [0, 16], sizes = [8, 8], strides = [1, 1]} : vector<8x32xf32> to vector<8x8xf32>
    %cst_44 = arith.constant dense<0.000000e+00> : vector<8x8xf32>
    %72 = tpu.matmul %69, %70, %cst_44 {dimension_numbers = #tpu.dot_dimension_numbers<[1], [1], [0], [0], [0, 0, 1, 0], [], []>} : vector<8x8xf32>, vector<8x8xf32>, vector<8x8xf32> -> vector<8x8xf32>
    %73 = arith.addf %72, %24 : vector<8x8xf32>
    %cst_45 = arith.constant dense<0xFF800000> : vector<8xf32>
    %74 = vector.multi_reduction <maximumf>, %73, %cst_45 [1] : vector<8x8xf32> to vector<8xf32>
    %75 = vector.shape_cast %74 : vector<8xf32> to vector<8x1xf32>
    %cst_46 = arith.constant 0xFF800000 : f32
    %76 = vector.broadcast %cst_46 : f32 to vector<8x1xf32>
    %77 = arith.cmpf oeq, %75, %76 : vector<8x1xf32>
    %cst_47 = arith.constant 0.000000e+00 : f32
    %78 = vector.broadcast %cst_47 : f32 to vector<8x1xf32>
    %79 = arith.select %77, %78, %75 : vector<8x1xi1>, vector<8x1xf32>
    %80 = vector.broadcast %79 : vector<8x1xf32> to vector<8x8xf32>
    %81 = arith.subf %73, %80 : vector<8x8xf32>
    %82 = math.exp %81 : vector<8x8xf32>
    %cst_48 = arith.constant dense<0.000000e+00> : vector<8xf32>
    %83 = vector.multi_reduction <add>, %82, %cst_48 [1] : vector<8x8xf32> to vector<8xf32>
    %84 = vector.shape_cast %83 : vector<8xf32> to vector<8x1xf32>
    %cst_49 = arith.constant dense<0.000000e+00> : vector<8x8xf32>
    %85 = tpu.matmul %82, %71, %cst_49 {dimension_numbers = #tpu.dot_dimension_numbers<[1], [0], [0], [1], [0, 0, 1, 1], [], []>} : vector<8x8xf32>, vector<8x8xf32>, vector<8x8xf32> -> vector<8x8xf32>
    %cst_50 = arith.constant 1.000000e+00 : f32
    %86 = vector.broadcast %cst_50 : f32 to vector<8x1xf32>
    %87 = arith.divf %86, %84 : vector<8x1xf32>
    %88 = vector.broadcast %87 : vector<8x1xf32> to vector<8x8xf32>
    %89 = arith.mulf %85, %88 : vector<8x8xf32>
    %c0_51 = arith.constant 0 : index
    %c16 = arith.constant 16 : index
    %90 = vector.load %arg15[%c0_51, %c16] : memref<8x32xf32, #tpu.memory_space<vmem>>, vector<8x8xf32>
    tpu.vector_store %arg15[%c0_51, %c16], %89 {strides = array<i32>} : memref<8x32xf32, #tpu.memory_space<vmem>>, vector<8x8xf32>,
    %91 = vector.extract_strided_slice %8 {offsets = [0, 24], sizes = [8, 8], strides = [1, 1]} : vector<8x32xf32> to vector<8x8xf32>
    %92 = vector.extract_strided_slice %15 {offsets = [0, 24], sizes = [8, 8], strides = [1, 1]} : vector<8x32xf32> to vector<8x8xf32>
    %93 = vector.extract_strided_slice %22 {offsets = [0, 24], sizes = [8, 8], strides = [1, 1]} : vector<8x32xf32> to vector<8x8xf32>
    %cst_52 = arith.constant dense<0.000000e+00> : vector<8x8xf32>
    %94 = tpu.matmul %91, %92, %cst_52 {dimension_numbers = #tpu.dot_dimension_numbers<[1], [1], [0], [0], [0, 0, 1, 0], [], []>} : vector<8x8xf32>, vector<8x8xf32>, vector<8x8xf32> -> vector<8x8xf32>
    %95 = arith.addf %94, %24 : vector<8x8xf32>
    %cst_53 = arith.constant dense<0xFF800000> : vector<8xf32>
    %96 = vector.multi_reduction <maximumf>, %95, %cst_53 [1] : vector<8x8xf32> to vector<8xf32>
    %97 = vector.shape_cast %96 : vector<8xf32> to vector<8x1xf32>
    %cst_54 = arith.constant 0xFF800000 : f32
    %98 = vector.broadcast %cst_54 : f32 to vector<8x1xf32>
    %99 = arith.cmpf oeq, %97, %98 : vector<8x1xf32>
    %cst_55 = arith.constant 0.000000e+00 : f32
    %100 = vector.broadcast %cst_55 : f32 to vector<8x1xf32>
    %101 = arith.select %99, %100, %97 : vector<8x1xi1>, vector<8x1xf32>
    %102 = vector.broadcast %101 : vector<8x1xf32> to vector<8x8xf32>
    %103 = arith.subf %95, %102 : vector<8x8xf32>
    %104 = math.exp %103 : vector<8x8xf32>
    %cst_56 = arith.constant dense<0.000000e+00> : vector<8xf32>
    %105 = vector.multi_reduction <add>, %104, %cst_56 [1] : vector<8x8xf32> to vector<8xf32>
    %106 = vector.shape_cast %105 : vector<8xf32> to vector<8x1xf32>
    %cst_57 = arith.constant dense<0.000000e+00> : vector<8x8xf32>
    %107 = tpu.matmul %104, %93, %cst_57 {dimension_numbers = #tpu.dot_dimension_numbers<[1], [0], [0], [1], [0, 0, 1, 1], [], []>} : vector<8x8xf32>, vector<8x8xf32>, vector<8x8xf32> -> vector<8x8xf32>
    %cst_58 = arith.constant 1.000000e+00 : f32
    %108 = vector.broadcast %cst_58 : f32 to vector<8x1xf32>
    %109 = arith.divf %108, %106 : vector<8x1xf32>
    %110 = vector.broadcast %109 : vector<8x1xf32> to vector<8x8xf32>
    %111 = arith.mulf %107, %110 : vector<8x8xf32>
    %c0_59 = arith.constant 0 : index
    %c24 = arith.constant 24 : index
    %112 = vector.load %arg15[%c0_59, %c24] : memref<8x32xf32, #tpu.memory_space<vmem>>, vector<8x8xf32>
    tpu.vector_store %arg15[%c0_59, %c24], %111 {strides = array<i32>} : memref<8x32xf32, #tpu.memory_space<vmem>>, vector<8x8xf32>,
    %c0_60 = arith.constant 0 : index
    %c0_61 = arith.constant 0 : index
    %113 = vector.load %arg15[%c0_60, %c0_61] : memref<8x32xf32, #tpu.memory_space<vmem>>, vector<8x32xf32>
    %c0_62 = arith.constant 0 : index
    %c0_63 = arith.constant 0 : index
    %114 = vector.load %arg9[%c0_62, %c0_63] : memref<32x32xf32, #tpu.memory_space<vmem>>, vector<32x32xf32>
    %cst_64 = arith.constant dense<0.000000e+00> : vector<8x32xf32>
    %115 = tpu.matmul %113, %114, %cst_64 {dimension_numbers = #tpu.dot_dimension_numbers<[1], [0], [0], [1], [0, 0, 1, 1], [], []>} : vector<8x32xf32>, vector<32x32xf32>, vector<8x32xf32> -> vector<8x32xf32>
    %c0_65 = arith.constant 0 : index
    %c0_66 = arith.constant 0 : index
    %116 = vector.load %arg13[%c0_65, %c0_66] : memref<1x32xf32, #tpu.memory_space<vmem>>, vector<1x32xf32>
    %117 = vector.broadcast %116 : vector<1x32xf32> to vector<8x32xf32>
    %118 = arith.addf %115, %117 : vector<8x32xf32>
    %c0_67 = arith.constant 0 : index
    %c0_68 = arith.constant 0 : index
    %c0_69 = arith.constant 0 : index
    %119 = vector.load %arg14[%c0_67, %c0_68, %c0_69] : memref<1x8x32xf32, #tpu.memory_space<vmem>>, vector<1x8x32xf32>
    %120 = vector.shape_cast %119 : vector<1x8x32xf32> to vector<8x32xf32>
    %121 = vector.shape_cast %118 : vector<8x32xf32> to vector<1x8x32xf32>
    tpu.vector_store %arg14[%c0_67, %c0_68, %c0_69], %121 {strides = array<i32>} : memref<1x8x32xf32, #tpu.memory_space<vmem>>, vector<1x8x32xf32>,
    return
  }
  func.func @transform_0(%arg0: i32, %arg1: i32) -> (i32, i32, i32) {
    %c0_i32 = arith.constant 0 : i32
    %c0_i32_0 = arith.constant 0 : i32
    return %arg0, %arg1, %c0_i32 : i32, i32, i32
  }
  func.func @transform_1(%arg0: i32, %arg1: i32) -> (i32, i32, i32) {
    %c0_i32 = arith.constant 0 : i32
    %c0_i32_0 = arith.constant 0 : i32
    %c0_i32_1 = arith.constant 0 : i32
    return %arg0, %c0_i32, %c0_i32_0 : i32, i32, i32
  }
  func.func @transform_2(%arg0: i32, %arg1: i32) -> (i32, i32, i32) {
    %c0_i32 = arith.constant 0 : i32
    %c0_i32_0 = arith.constant 0 : i32
    %c0_i32_1 = arith.constant 0 : i32
    return %arg0, %c0_i32, %c0_i32_0 : i32, i32, i32
  }
  func.func @transform_3(%arg0: i32, %arg1: i32) -> (i32, i32, i32, i32) {
    %c0_i32 = arith.constant 0 : i32
    %c0_i32_0 = arith.constant 0 : i32
    %c0_i32_1 = arith.constant 0 : i32
    return %arg0, %c0_i32, %arg1, %c0_i32_0 : i32, i32, i32, i32
  }
  func.func @transform_4(%arg0: i32, %arg1: i32) -> (i32, i32) {
    %c0_i32 = arith.constant 0 : i32
    %c0_i32_0 = arith.constant 0 : i32
    %c0_i32_1 = arith.constant 0 : i32
    return %c0_i32, %c0_i32_0 : i32, i32
  }
  func.func @transform_5(%arg0: i32, %arg1: i32) -> (i32, i32) {
    %c0_i32 = arith.constant 0 : i32
    %c0_i32_0 = arith.constant 0 : i32
    %c0_i32_1 = arith.constant 0 : i32
    return %c0_i32, %c0_i32_0 : i32, i32
  }
  func.func @transform_6(%arg0: i32, %arg1: i32) -> (i32, i32) {
    %c0_i32 = arith.constant 0 : i32
    %c0_i32_0 = arith.constant 0 : i32
    %c0_i32_1 = arith.constant 0 : i32
    return %c0_i32, %c0_i32_0 : i32, i32
  }
  func.func @transform_7(%arg0: i32, %arg1: i32) -> (i32, i32) {
    %c0_i32 = arith.constant 0 : i32
    %c0_i32_0 = arith.constant 0 : i32
    %c0_i32_1 = arith.constant 0 : i32
    return %c0_i32, %c0_i32_0 : i32, i32
  }
  func.func @transform_8(%arg0: i32, %arg1: i32) -> (i32, i32) {
    %c0_i32 = arith.constant 0 : i32
    %c0_i32_0 = arith.constant 0 : i32
    %c0_i32_1 = arith.constant 0 : i32
    return %c0_i32, %c0_i32_0 : i32, i32
  }
  func.func @transform_9(%arg0: i32, %arg1: i32) -> (i32, i32) {
    %c0_i32 = arith.constant 0 : i32
    %c0_i32_0 = arith.constant 0 : i32
    %c0_i32_1 = arith.constant 0 : i32
    return %c0_i32, %c0_i32_0 : i32, i32
  }
  func.func @transform_10(%arg0: i32, %arg1: i32) -> (i32, i32) {
    %c0_i32 = arith.constant 0 : i32
    %c0_i32_0 = arith.constant 0 : i32
    %c0_i32_1 = arith.constant 0 : i32
    return %c0_i32, %c0_i32_0 : i32, i32
  }
  func.func @transform_11(%arg0: i32, %arg1: i32) -> (i32, i32) {
    %c0_i32 = arith.constant 0 : i32
    %c0_i32_0 = arith.constant 0 : i32
    %c0_i32_1 = arith.constant 0 : i32
    return %c0_i32, %c0_i32_0 : i32, i32
  }
  func.func @transform_12(%arg0: i32, %arg1: i32) -> (i32, i32, i32) {
    %c0_i32 = arith.constant 0 : i32
    %c0_i32_0 = arith.constant 0 : i32
    return %arg0, %arg1, %c0_i32 : i32, i32, i32
  }
}

</mosaic_0001>

<bundles_post_ra>
// kernel: tpu_custom_call.1
= control target key start
LH: loop header
LB: loop body
LE: loop exit
PB: predicated region body
PF: predicated region fallthrough
CT: control target
= control target key end

     0   :  { %s3118_s0 = inlined_call_operand.hbm [shape: f32[2,8,32], index: 0, kind: input, shape index: {}]   ;;  %s3119_s1 = inlined_call_operand.hbm [shape: f32[2,8,32], index: 1, kind: input, shape index: {}]   ;;  %s3120_s2 = inlined_call_operand.hbm [shape: f32[2,8,32], index: 2, kind: input, shape index: {}]   ;;  %s3121_s3 = inlined_call_operand.hbm [shape: f32[2,1,8,8], index: 3, kind: input, shape index: {}]   ;;  %s3122_s4 = inlined_call_operand.hbm [shape: f32[32,32], index: 4, kind: input, shape index: {}]   ;;  %s3123_s5 = inlined_call_operand.hbm [shape: f32[32,32], index: 5, kind: input, shape index: {}]   ;;  %s3124_s6 = inlined_call_operand.hbm [shape: f32[32,32], index: 6, kind: input, shape index: {}]   ;;  %s3125_s7 = inlined_call_operand.hbm [shape: f32[32,32], index: 7, kind: input, shape index: {}]   ;;  %s3126_s8 = inlined_call_operand.vmem [shape: f32[1,32], index: 8, kind: input, shape index: {}]   ;;  %s3127_s9 = inlined_call_operand.vmem [shape: f32[1,32], index: 9, kind: input, shape index: {}]   ;;  %s3128_s10 = inlined_call_operand.vmem [shape: f32[1,32], index: 10, kind: input, shape index: {}]   ;;  %s3129_s11 = inlined_call_operand.vmem [shape: f32[1,32], index: 11, kind: input, shape index: {}]   ;;  %s3130_s12 = inlined_call_operand.hbm [shape: f32[2,8,32], index: 12, kind: output, shape index: {}]  }
   0x1   :  { %3154 = sst [smem:[#allocation32_spill]] %s3119_s1 }
   0x2   :  { %3155 = sst [smem:[#allocation33_spill]] %s3122_s4 }
   0x3   :  { %3156 = sst [smem:[#allocation34_spill]] %s3123_s5 }
   0x4   :  { %3157 = sst [smem:[#allocation35_spill]] %s3126_s8 }
   0x5   :  { %3158 = sst [smem:[#allocation36_spill]] %s3127_s9 }
   0x6   :  { %3159 = sst [smem:[#allocation37_spill]] %s3128_s10 }
   0x7   :  { %3160 = sst [smem:[#allocation38_spill]] %s3129_s11 }
   0x8   :  { %3161 = sst [smem:[#allocation39_spill]] %s3130_s12 }
   0x9   :  { %17 = vsyncpa [#allocation4], 0 }
   0xa   :  { %19 = vsyncpa [#allocation4 + $0x1], 0 }
   0xb   :  { %20 = vsyncpa [#allocation7], 0 }
   0xc   :  { %22 = vsyncpa [#allocation7 + $0x1], 0 }
   0xd   :  { %23 = vsyncpa [#allocation10], 0 }
   0xe   :  { %25 = vsyncpa [#allocation10 + $0x1], 0 }
   0xf   :  { %26 = vsyncpa [#allocation13], 0 }
  0x10   :  { %27 = vsyncpa [#allocation16], 0 }
  0x11   :  { %28 = vsyncpa [#allocation5], 0 }
  0x12   :  { %30 = vsyncpa [#allocation5 + $0x1], 0  ;;  %s2607_s21 = smov 0   ;;  %s2609_s22 = smov 0  }
  0x13   :  { %s2611_s23 = smov 0   ;;  %s2613_s24 = smov 0  }
  0x14   :  { %s2615_s25 = smov 0   ;;  %s2617_s26 = smov 0  }
  0x15 LB: > { %3162 = sst [smem:[#allocation25_spill]] %s2500_s21  ;;  %s2638_s27 = sadd.s32 4294967295, %s2520_s26   ;;  %s2520_s26 = sphi %s2617_s26, %s36_s26   ;;  %s2516_s25 = sphi %s2615_s25, %s3212_s25   ;;  %s2512_s24 = sphi %s2613_s24, %s3211_s24   ;;  %s2508_s23 = sphi %s2611_s23, %s3215_s23   ;;  %s2504_s22 = sphi %s2609_s22, %s3214_s22   ;;  %s2500_s21 = sphi %s2607_s21, %s3213_s21  }
  0x16   : > { %3163 = sst [smem:[#allocation26_spill]] %s2512_s24  ;;  %s1848_s28 = sadd.s32 4294967294, %s2520_s26  }
  0x17   : > { %3164 = sst [smem:[#allocation27_spill]] %s2516_s25  ;;  %p70_p0 = scmp.ne.s32.totalorder %s2504_s22, %s2500_s21 }
  0x18   : > { %p3134_p1 = scmp.eq.s32.totalorder %s2638_s27, 0  ;;  %p350_p3 = scmp.eq.s32.totalorder %s1848_s28, 1 }
  0x19   : > { %p1849_p5 = scmp.ge.s32.totalorder %s2520_s26, 1  ;;  %p357_p7 = scmp.lt.s32.totalorder %s2520_s26, 3 }
  0x1a   : > { %p2647_p4 = por %p3134_p1, %p70_p0  ;;  %p2652_p6 = por %p350_p3, %p70_p0 }
  0x1b   : > { %p2657_p8 = pnand %p1849_p5, %p357_p7  ;;  %s2522_s14 = smov [#allocation11]  }
  0x1c   : > { %s3165_s29 = scalar_select %p2647_p4, 1, 0 }
  0x1d   : > { %s3166_s30 = scalar_select %p2652_p6, 1, 0 }
  0x1e   : > { %s3168_s13 = scalar_select %p2657_p8, 1, 0 }
  0x1f   : > { %3167 = sst [smem:[#allocation28_spill]] %s3166_s30  ;;  %s369_s15 = sshll.u32 %s2522_s14, 4  ;;  %s2661_s15 = int_to_ptr.vmem [resolvable:$true] %s369_s15 }
  0x20   : > { %p2067_p9 = pneg %p2657_p8  ;;  %s2523_s17 = smov [#allocation12]  }
  0x21   : > { %s382_s18 = sshll.u32 %s2523_s17, 4  ;;  %s3170_s4 = sld [smem:[#allocation33_spill]]  ;;  %s2672_s18 = int_to_ptr.vmem [resolvable:$true] %s382_s18 }
  0x22   : > { %p2668_p11 = pnand %p2067_p9, %p3134_p1 }
  0x24   : > { %s3169_s16 = scalar_select %p2668_p11, 1, 0 }
  0x25   : > { %p2682_p13 = pneg %p2668_p11 }
  0x27   : > { %s2186_s28 = scalar_lea.hbm %s3170_s4, 512 }
  0x28   : > { %p2187_p12 = scmp.ne.s32.totalorder %s3170_s4, %s2186_s28  ;;  %p2193_p5 = scmp.lt.u32.totalorder %s2186_s28, %s3170_s4 }
  0x29   : > { %s3171_s21 = scalar_select %p2682_p13, 1, 0 }
  0x2a   : > { %p2189_p0 = pnand %p2682_p13, %p2187_p12 }
  0x2c   : > { %p2190_p3 = pneg %p2189_p0 }
  0x2e   : > { %p2195_p7 = pnand %p2193_p5, %p2190_p3 }
  0x30   : > { %2198 = shalt.err (!%p2195_p7)
}
  0x31   : > { %s2199_s30 = scalar_lea.vmem %s2661_s15, 512  ;;  %p2207_p2 = scmp.lt.s32.totalorder %s2661_s15, %s2661_s15 }
  0x32   : > { %p2200_p9 = scmp.ne.s32.totalorder %s2661_s15, %s2199_s30  ;;  %p2208_p6 = scmp.lt.s32.totalorder %s2199_s30, %s2199_s30 }
  0x34   : > { %p2202_p10 = pnand %p2200_p9, %p2682_p13  ;;  %p2209_p12 = por %p2208_p6, %p2207_p2 }
  0x36   : > { %p2203_p1 = pneg %p2202_p10 }
  0x38   : > { %p2210_p0 = pnand %p2209_p12, %p2203_p1 }
  0x3a   : > { %2213 = shalt.err (!%p2210_p0)
}
  0x3b   : > { %s3135_s19 = smov 128   ;;  %s3137_s12 = smov 8  }
  0x3c   : > { %2070 = dma.hbm_to_vmem [thread:$0]  (!%p2668_p11), %s3170_s4, 512, %s2661_s15, [#allocation10], %s3135_s19, %s3135_s19, %s3137_s12  }
  0x3d   : > { %s3172_s5 = sld [smem:[#allocation34_spill]] }
  0x43   : > { %s2214_s30 = scalar_lea.hbm %s3172_s5, 512 }
  0x44   : > { %p2215_p1 = scmp.ne.s32.totalorder %s3172_s5, %s2214_s30  ;;  %p2221_p10 = scmp.lt.u32.totalorder %s2214_s30, %s3172_s5 }
  0x46   : > { %p2217_p2 = pnand %p2215_p1, %p2682_p13 }
  0x48   : > { %p2218_p6 = pneg %p2217_p2 }
  0x4a   : > { %p2223_p3 = pnand %p2221_p10, %p2218_p6 }
  0x4c   : > { %2226 = shalt.err (!%p2223_p3)
}
  0x4d   : > { %s2227_s15 = scalar_lea.vmem %s2672_s18, 512  ;;  %p2235_p12 = scmp.lt.s32.totalorder %s2672_s18, %s2672_s18 }
  0x4e   : > { %p2228_p5 = scmp.ne.s32.totalorder %s2672_s18, %s2227_s15  ;;  %p2236_p0 = scmp.lt.s32.totalorder %s2227_s15, %s2227_s15 }
  0x50   : > { %p2230_p7 = pnand %p2228_p5, %p2682_p13  ;;  %p2237_p1 = por %p2236_p0, %p2235_p12 }
  0x52   : > { %p2231_p9 = pneg %p2230_p7 }
  0x54   : > { %p2238_p2 = pnand %p2237_p1, %p2231_p9 }
  0x56   : > { %2241 = shalt.err (!%p2238_p2)
}
  0x57   : > { %2073 = dma.hbm_to_vmem [thread:$0]  (!%p2668_p11), %s3172_s5, 512, %s2672_s18, [#allocation13], %s3135_s19, %s3135_s19, %s3137_s12  }
  0x58   : > { %s48_s11 = sadd.s32 1, %s2516_s25  ;;  %s57_s24 = sadd.s32 1, %s2508_s23 }
  0x59   : > { %p50_p6 = scmp.ge.s32.totalorder %s48_s11, 2  ;;  %p64_p10 = scmp.ne.s32.totalorder %s2508_s23, %s2504_s22 }
  0x5a   : > { %p65_p3 = scmp.eq.s32.totalorder %s2520_s26, 0  ;;  %p2101_p5 = scmp.lt.s32.totalorder %s2520_s26, 2 }
  0x5b   : > { %s3217_s11 = smov (%p50_p6, %s48_s11), 0  ;;  %p3174_p9 = scmp.eq.s32.totalorder %s2638_s27, 1 }
  0x5c   : > { %3173 = sst [smem:[#allocation29_spill]] %s3217_s11  ;;  %p66_p7 = por %p65_p3, %p64_p10 }
  0x5d   : > { %p2742_p12 = por %p3174_p9, %p64_p10  ;;  %s52_s28 = ssub.s32 %s2516_s25, %s3217_s11 }
  0x5e   : > { %s3139_s18 = sand.u32 1, %s2508_s23   ;;  %p55_p0 = scmp.eq.s32.totalorder %s52_s28, 0 }
  0x5f   : > { %s3175_s20 = scalar_select %p2742_p12, 1, 0 }
  0x60   : > { %s2751_s14 = sshll.u32 %s3139_s18, 3  ;;  %s2754_s17 = sshll.u32 %s2516_s25, 7 }
  0x61   : > { %3176 = sst [smem:[#allocation30_spill]] %s3175_s20  ;;  %p2756_p1 = pnand %p2101_p5, %p66_p7 }
  0x62   : > { %s2761_s15 = scalar_select %p55_p0, %s2508_s23, %s57_s24  }
  0x63   : > { %s3177_s30 = scalar_select %p2756_p1, 1, 0 }
  0x64   : > { %3178 = sst [smem:[#allocation31_spill]] %s2761_s15  ;;  %s3144_s9 = sand.u32 1, %s2520_s26  }
  0x65   : > { %s3179_s1 = sld [smem:[#allocation32_spill]]  ;;  %s457_s28 = scalar_lea.vmem [#allocation6], %s2751_s14 }
  0x66   : > { %s464_s18 = sshll.u32 %s457_s28, 4  ;;  %s2775_s4 = scalar_lea.sflag [#allocation7], %s3144_s9  ;;  %s2771_s18 = int_to_ptr.vmem [resolvable:$true] %s464_s18 }
  0x67   : > { %p2781_p6 = pneg %p2756_p1 }
  0x6b   : > { %s2768_s12 = scalar_lea.hbm %s3179_s1, %s2754_s17  ;;  %s2247_s28 = scalar_lea.hbm %s3179_s1, 256 }
  0x6c   : > { %s2242_s5 = scalar_lea.hbm %s2768_s12, 128  ;;  %p2248_p5 = scmp.lt.u32.totalorder %s2768_s12, %s3179_s1 }
  0x6d   : > { %p2243_p2 = scmp.ne.s32.totalorder %s2768_s12, %s2242_s5  ;;  %p2249_p7 = scmp.lt.u32.totalorder %s2247_s28, %s2242_s5 }
  0x6e   : > { %p2251_p0 = scmp.lt.u32.totalorder %s2242_s5, %s2768_s12 }
  0x6f   : > { %p2245_p10 = pnand %p2781_p6, %p2243_p2  ;;  %p2250_p9 = por %p2249_p7, %p2248_p5 }
  0x71   : > { %p2246_p3 = pneg %p2245_p10  ;;  %p2252_p12 = por %p2251_p0, %p2250_p9 }
  0x73   : > { %p2253_p4 = pnand %p2252_p12, %p2246_p3 }
  0x75   : > { %2256 = shalt.err (!%p2253_p4)
}
  0x76   : > { %s2257_s9 = scalar_lea.vmem %s2771_s18, 128  ;;  %s2526_s19 = smov [#allocation6]  }
  0x77   : > { %p2258_p2 = scmp.ne.s32.totalorder %s2771_s18, %s2257_s9  ;;  %s2262_s10 = sshll.u32 %s2526_s19, 4  ;;  %s2263_s10 = int_to_ptr.vmem [resolvable:$false] %s2262_s10 }
  0x78   : > { %s2264_s25 = scalar_lea.vmem %s2263_s10, 256  ;;  %p2265_p11 = scmp.lt.s32.totalorder %s2771_s18, %s2263_s10 }
  0x79   : > { %p2260_p10 = pnand %p2258_p2, %p2781_p6  ;;  %p2266_p13 = scmp.lt.s32.totalorder %s2264_s25, %s2257_s9 }
  0x7b   : > { %p2261_p8 = pneg %p2260_p10  ;;  %p2267_p5 = por %p2266_p13, %p2265_p11 }
  0x7d   : > { %p2268_p7 = pnand %p2267_p5, %p2261_p8 }
  0x7f   : > { %2271 = shalt.err (!%p2268_p7)
}
  0x80   : > { %2086 = dma.hbm_to_vmem [thread:$0]  (!%p2756_p1), %s2768_s12, 128, %s2771_s18, %s2775_s4  }
  0x81   : > { %s2527_s5 = smov [#allocation14]   ;;  %s2528_s28 = smov [#allocation15]  }
  0x82   : > { %s395_s11 = sshll.u32 %s2527_s5, 4  ;;  %s408_s1 = sshll.u32 %s2528_s28, 4  ;;  %s396_s11 = int_to_ptr.vmem [resolvable:$true] %s395_s11  ;;  %s2805_s1 = int_to_ptr.vmem [resolvable:$true] %s408_s1 }
  0x83   : > { %s2272_s9 = scalar_lea.hbm %s3124_s6, 512  ;;  %p3181_p8 = scmp.ne.s32.totalorder %s3171_s21, 0 }
  0x84   : > { %p2273_p4 = scmp.ne.s32.totalorder %s3124_s6, %s2272_s9  ;;  %p2279_p12 = scmp.lt.u32.totalorder %s2272_s9, %s3124_s6 }
  0x86   : > { %p2275_p11 = pnand %p2273_p4, %p3181_p8 }
  0x88   : > { %p2276_p13 = pneg %p2275_p11 }
  0x8a   : > { %p2281_p3 = pnand %p2279_p12, %p2276_p13 }
  0x8c   : > { %2284 = shalt.err (!%p2281_p3)
}
  0x8d   : > { %s2285_s18 = scalar_lea.vmem %s396_s11, 512  ;;  %p2293_p10 = scmp.lt.s32.totalorder %s396_s11, %s396_s11 }
  0x8e   : > { %p2286_p9 = scmp.ne.s32.totalorder %s396_s11, %s2285_s18  ;;  %p2294_p5 = scmp.lt.s32.totalorder %s2285_s18, %s2285_s18 }
  0x90   : > { %p2288_p0 = pnand %p2286_p9, %p3181_p8  ;;  %p2295_p7 = por %p2294_p5, %p2293_p10 }
  0x92   : > { %p2289_p2 = pneg %p2288_p0 }
  0x94   : > { %p2296_p1 = pnand %p2295_p7, %p2289_p2 }
  0x96   : > { %2299 = shalt.err (!%p2296_p1)
}
  0x97   : > { %p3182_p4 = scmp.ne.s32.totalorder %s3169_s16, 0  ;;  %s3183_s15 = smov 8  }
  0x98   : > { %s3184_s5 = smov 128   ;;  %s2300_s9 = scalar_lea.hbm %s3125_s7, 512 }
  0x99   : > { %2076 = dma.hbm_to_vmem [thread:$0]  (!%p3182_p4), %s3124_s6, 512, %s396_s11, [#allocation13], %s3184_s5, %s3184_s5, %s3183_s15  }
  0x9a   : > { %p2301_p11 = scmp.ne.s32.totalorder %s3125_s7, %s2300_s9  ;;  %p2307_p12 = scmp.lt.u32.totalorder %s2300_s9, %s3125_s7 }
  0x9c   : > { %p2303_p1 = pnand %p2301_p11, %p3181_p8 }
  0x9e   : > { %p2304_p13 = pneg %p2303_p1 }
  0xa0   : > { %p2309_p3 = pnand %p2307_p12, %p2304_p13 }
  0xa2   : > { %2312 = shalt.err (!%p2309_p3)
}
  0xa3   : > { %s2313_s11 = scalar_lea.vmem %s2805_s1, 512  ;;  %p2321_p10 = scmp.lt.s32.totalorder %s2805_s1, %s2805_s1 }
  0xa4   : > { %p2314_p9 = scmp.ne.s32.totalorder %s2805_s1, %s2313_s11  ;;  %p2322_p5 = scmp.lt.s32.totalorder %s2313_s11, %s2313_s11 }
  0xa6   : > { %p2316_p0 = pnand %p2314_p9, %p3181_p8  ;;  %p2323_p7 = por %p2322_p5, %p2321_p10 }
  0xa8   : > { %p2317_p2 = pneg %p2316_p0 }
  0xaa   : > { %p2324_p11 = pnand %p2323_p7, %p2317_p2 }
  0xac   : > { %2327 = shalt.err (!%p2324_p11)
}
  0xad   : > { %2079 = dma.hbm_to_vmem [thread:$0]  (!%p3182_p4), %s3125_s7, 512, %s2805_s1, [#allocation16], %s3184_s5, %s3184_s5, %s3183_s15  }
  0xae   : > { %s2858_s19 = scalar_lea.hbm %s3118_s0, %s2754_s17  ;;  %s438_s16 = scalar_lea.vmem [#allocation3], %s2751_s14 }
  0xaf   : > { %s446_s10 = sshll.u32 %s438_s16, 4  ;;  %s3185_s9 = sand.u32 1, %s2508_s23   ;;  %s447_s10 = int_to_ptr.vmem [resolvable:$true] %s446_s10 }
  0xb0   : > { %s435_s25 = scalar_lea.sflag [#allocation4], %s3185_s9  ;;  %s2328_s12 = scalar_lea.hbm %s2858_s19, 128 }
  0xb1   : > { %p2329_p8 = scmp.ne.s32.totalorder %s2858_s19, %s2328_s12  ;;  %s2333_s5 = scalar_lea.hbm %s3118_s0, 256 }
  0xb2   : > { %p2334_p4 = scmp.lt.u32.totalorder %s2858_s19, %s3118_s0  ;;  %p2335_p12 = scmp.lt.u32.totalorder %s2333_s5, %s2328_s12 }
  0xb3   : > { %p2331_p1 = pnand %p2329_p8, %p2781_p6  ;;  %p2337_p9 = scmp.lt.u32.totalorder %s2328_s12, %s2858_s19 }
  0xb4   : > { %p2336_p3 = por %p2335_p12, %p2334_p4 }
  0xb5   : > { %p2332_p13 = pneg %p2331_p1 }
  0xb6   : > { %p2338_p0 = por %p2337_p9, %p2336_p3 }
  0xb8   : > { %p2339_p2 = pnand %p2338_p0, %p2332_p13 }
  0xba   : > { %2342 = shalt.err (!%p2339_p2)
}
  0xbb   : > { %s2343_s8 = scalar_lea.vmem %s447_s10, 128  ;;  %s2529_s20 = smov [#allocation3]  }
  0xbc   : > { %p2344_p10 = scmp.ne.s32.totalorder %s447_s10, %s2343_s8  ;;  %s2348_s21 = sshll.u32 %s2529_s20, 4  ;;  %s2349_s21 = int_to_ptr.vmem [resolvable:$false] %s2348_s21 }
  0xbd   : > { %s2350_s28 = scalar_lea.vmem %s2349_s21, 256  ;;  %p2351_p11 = scmp.lt.s32.totalorder %s447_s10, %s2349_s21 }
  0xbe   : > { %p2346_p5 = pnand %p2344_p10, %p2781_p6  ;;  %p2352_p8 = scmp.lt.s32.totalorder %s2350_s28, %s2343_s8 }
  0xc0   : > { %p2347_p7 = pneg %p2346_p5  ;;  %p2353_p1 = por %p2352_p8, %p2351_p11 }
  0xc2   : > { %p2354_p4 = pnand %p2353_p1, %p2347_p7 }
  0xc4   : > { %2357 = shalt.err (!%p2354_p4)
}
  0xc5   : > { %p3186_p12 = scmp.ne.s32.totalorder %s3177_s30, 0  ;;  %s2884_s12 = scalar_lea.hbm %s3120_s2, %s2754_s17 }
  0xc6   : > { %s475_s1 = scalar_lea.vmem [#allocation8], %s2751_s14  ;;  %s2358_s5 = scalar_lea.hbm %s2884_s12, 128 }
  0xc7   : > { %2083 = dma.hbm_to_vmem [thread:$0]  (!%p3186_p12), %s2858_s19, 128, %s447_s10, %s435_s25  }
  0xc8   : > { %s482_s15 = sshll.u32 %s475_s1, 4  ;;  %p2359_p13 = scmp.ne.s32.totalorder %s2884_s12, %s2358_s5  ;;  %s483_s15 = int_to_ptr.vmem [resolvable:$true] %s482_s15 }
  0xc9   : > { %s2363_s19 = scalar_lea.hbm %s3120_s2, 256  ;;  %p2364_p0 = scmp.lt.u32.totalorder %s2884_s12, %s3120_s2 }
  0xca   : > { %p2361_p3 = pnand %p2359_p13, %p2781_p6  ;;  %p2365_p2 = scmp.lt.u32.totalorder %s2363_s19, %s2358_s5 }
  0xcb   : > { %p2367_p5 = scmp.lt.u32.totalorder %s2358_s5, %s2884_s12 }
  0xcc   : > { %p2362_p9 = pneg %p2361_p3  ;;  %p2366_p10 = por %p2365_p2, %p2364_p0 }
  0xce   : > { %p2368_p7 = por %p2367_p5, %p2366_p10 }
  0xd0   : > { %p2369_p11 = pnand %p2368_p7, %p2362_p9 }
  0xd2   : > { %2372 = shalt.err (!%p2369_p11)
}
  0xd3   : > { %s2373_s8 = scalar_lea.vmem %s483_s15, 128  ;;  %s2530_s20 = smov [#allocation8]  }
  0xd4   : > { %p2374_p8 = scmp.ne.s32.totalorder %s483_s15, %s2373_s8  ;;  %s2378_s21 = sshll.u32 %s2530_s20, 4  ;;  %s2379_s21 = int_to_ptr.vmem [resolvable:$false] %s2378_s21 }
  0xd5   : > { %s2380_s28 = scalar_lea.vmem %s2379_s21, 256  ;;  %p2381_p13 = scmp.lt.s32.totalorder %s483_s15, %s2379_s21 }
  0xd6   : > { %p2376_p1 = pnand %p2374_p8, %p2781_p6  ;;  %p2382_p3 = scmp.lt.s32.totalorder %s2380_s28, %s2373_s8 }
  0xd8   : > { %p2377_p4 = pneg %p2376_p1  ;;  %p2383_p12 = por %p2382_p3, %p2381_p13 }
  0xda   : > { %p2384_p0 = pnand %p2383_p12, %p2377_p4 }
  0xdc   : > { %2387 = shalt.err (!%p2384_p0)
}
  0xdd   : > { %p3187_p2 = scmp.ne.s32.totalorder %s3177_s30, 0  ;;  %s2909_s1 = scalar_lea.hbm %s3121_s3, %s2754_s17 }
  0xde   : > { %s493_s5 = scalar_lea.vmem [#allocation9], %s2751_s14  ;;  %s3188_s11 = sand.u32 1, %s2520_s26  }
  0xdf   : > { %2089 = dma.hbm_to_vmem [thread:$0]  (!%p3187_p2), %s2884_s12, 128, %s483_s15, %s2775_s4  }
  0xe0   : > { %s501_s18 = sshll.u32 %s493_s5, 4  ;;  %s490_s19 = scalar_lea.sflag [#allocation10], %s3188_s11  ;;  %s502_s18 = int_to_ptr.vmem [resolvable:$true] %s501_s18 }
  0xe1   : > { %s2388_s10 = scalar_lea.hbm %s2909_s1, 128  ;;  %s2393_s15 = scalar_lea.hbm %s3121_s3, 256 }
  0xe2   : > { %p2389_p12 = scmp.ne.s32.totalorder %s2909_s1, %s2388_s10  ;;  %p2394_p5 = scmp.lt.u32.totalorder %s2909_s1, %s3121_s3 }
  0xe3   : > { %p2395_p7 = scmp.lt.u32.totalorder %s2393_s15, %s2388_s10  ;;  %p2397_p8 = scmp.lt.u32.totalorder %s2388_s10, %s2909_s1 }
  0xe4   : > { %p2391_p9 = pnand %p2389_p12, %p2781_p6 }
  0xe5   : > { %p2396_p11 = por %p2395_p7, %p2394_p5 }
  0xe6   : > { %p2392_p10 = pneg %p2391_p9 }
  0xe7   : > { %p2398_p1 = por %p2397_p8, %p2396_p11 }
  0xe9   : > { %p2399_p4 = pnand %p2398_p1, %p2392_p10 }
  0xeb   : > { %2402 = shalt.err (!%p2399_p4)
}
  0xec   : > { %s2403_s14 = scalar_lea.vmem %s502_s18, 128  ;;  %s2531_s8 = smov [#allocation9]  }
  0xed   : > { %p2404_p13 = scmp.ne.s32.totalorder %s502_s18, %s2403_s14  ;;  %s2408_s20 = sshll.u32 %s2531_s8, 4  ;;  %s2409_s20 = int_to_ptr.vmem [resolvable:$false] %s2408_s20 }
  0xee   : > { %s2410_s21 = scalar_lea.vmem %s2409_s20, 256  ;;  %p2411_p12 = scmp.lt.s32.totalorder %s502_s18, %s2409_s20 }
  0xef   : > { %p2406_p3 = pnand %p2404_p13, %p2781_p6  ;;  %p2412_p9 = scmp.lt.s32.totalorder %s2410_s21, %s2403_s14 }
  0xf1   : > { %p2407_p0 = pneg %p2406_p3  ;;  %p2413_p2 = por %p2412_p9, %p2411_p12 }
  0xf3   : > { %p2414_p5 = pnand %p2413_p2, %p2407_p0 }
  0xf5   : > { %2417 = shalt.err (!%p2414_p5)
}
  0xf6   : > { %p3189_p7 = scmp.ne.s32.totalorder %s3177_s30, 0  ;;  %p3190_p10 = scmp.ne.s32.totalorder %s3168_s13, 0 }
  0xf7   : > { %s2934_s24 = sand.u32 (!%p3190_p10), 1, %s2504_s22   ;;  %p3191_p6 = scmp.ne.s32.totalorder (!%p3190_p10), %s3165_s29, 0 }
  0xf8   : > { %2092 = dma.hbm_to_vmem [thread:$0]  (!%p3189_p7), %s2909_s1, 128, %s502_s18, %s490_s19  }
  0xf9   : > { %510 = sbr.rel (%p3190_p10) target bundleno = 1827 (0x723), region = 68  ;;  %s2937_s28 = sshll.u32 (!%p3190_p10), %s2934_s24, 3 }
  0xfa   : > { %s513_s16 = scalar_lea.sflag (!%p3190_p10), [#allocation4], %s2934_s24  ;;  %s516_s9 = scalar_lea.vmem (!%p3190_p10), [#allocation3], %s2937_s28 }
 0x100   : > { %2471 = dma.done.wait (%p3191_p6), %s513_s16, 128  }
 0x101   : > { %2473 = vsyncadd (%p3191_p6), %s513_s16, 4294967168  ;;  %s521_s13 = sand.u32 1, %s2638_s27   ;;  %s525_s1 = scalar_lea.vmem [#allocation6], %s2937_s28 }
 0x102   : > { %s522_s30 = scalar_lea.sflag [#allocation7], %s521_s13 }
 0x103   : > { %2475 = dma.done.wait (%p3191_p6), %s522_s30, 256  }
 0x104   : > { %2477 = vsyncadd (%p3191_p6), %s522_s30, 4294967040  ;;  %s534_s5 = scalar_lea.vmem [#allocation8], %s2937_s28  ;;  %s540_s18 = scalar_lea.sflag [#allocation10], %s521_s13 }
 0x105   : > { %s543_s11 = scalar_lea.vmem [#allocation9], %s2937_s28 }
 0x106   : > { %2479 = dma.done.wait (%p3191_p6), %s540_s18, 128  }
 0x107   : > { %2481 = vsyncadd (%p3191_p6), %s540_s18, 4294967168  ;;  %p3192_p2 = scmp.eq.s32.totalorder %s2638_s27, 0 }
 0x109   : > { %2483 = dma.done.wait (%p3192_p2), [#allocation10], 512   ;;  %p3193_p11 = pmov %p3192_p2 }
 0x10a   : > { %p3194_p8 = pmov %p3192_p2 }
 0x10b   : > { %2485 = vsyncadd (%p3193_p11), [#allocation10], 4294966784 }
 0x10c   : > { %2487 = dma.done.wait (%p3194_p8), [#allocation13], 1024   ;;  %p3195_p1 = pmov %p3192_p2 }
 0x10e   : > { %2489 = vsyncadd (%p3195_p1), [#allocation13], 4294966272  ;;  %p3196_p4 = pmov %p3195_p1 }
 0x10f   : > { %p3197_p13 = pmov %p3195_p1 }
 0x110   : > { %2491 = dma.done.wait (%p3196_p4), [#allocation16], 512  }
 0x111   : > { %2493 = vsyncadd (%p3197_p13), [#allocation16], 4294966784  ;;  %v2532_v0 = vmov 0.0|0.0   ;;  %vm2533_vm0 = vmmov 0   ;;  %v2534_v1 = vmov 0.0   ;;  %v616_v2 = vld [vmem:[#allocation11] sm:$0xff] }
 0x112   : > { %2017 = vmatprep.subr.bf16.mxu0 %v2532_v0  ;;  %2023 = vmatprep.subr.bf16.mxu1 %v2532_v0  ;;  %v617_v3 = vld [vmem:[#allocation11 + $0x8] sm:$0xff]  ;;  %v703_v4 = vld [vmem:[#allocation12] sm:$0xff]  ;;  %v618_v7 = vld [vmem:[#allocation11 + $0x10] sm:$0xff]  ;;  %vm627_vm1 = vcmask 261120   ;;  %s3198_s19 = sld [smem:[#allocation35_spill]]  ;;  %s3199_s12 = sld [smem:[#allocation36_spill]] }
 0x113   : > { %1941 = vmatprep.mubr.msk.f32.mxu0 %vm2533_vm0, %v2534_v1  ;;  %1952 = vmatprep.mubr.msk.f32.mxu1 %vm2533_vm0, %v2534_v1  ;;  %v2018_v5 = vpack.c.bf16 %v617_v3, %v616_v2  ;;  %v704_v6 = vld [vmem:[#allocation12 + $0x8] sm:$0xff]  ;;  %v619_v8 = vld [vmem:[#allocation11 + $0x18] sm:$0xff]  ;;  %v705_v10 = vld [vmem:[#allocation12 + $0x10] sm:$0xff]  ;;  %vm873_vm2 = vcmask 64512   ;;  %s2535_s15 = smov 120   ;;  %s2536_s17 = smov 112  }
 0x114   : > { %v2024_v9 = vpack.c.bf16 %v704_v6, %v703_v4  ;;  %v706_v11 = vld [vmem:[#allocation12 + $0x18] sm:$0xff]  ;;  %v2021_v12 = vpack.c.bf16 %v619_v8, %v618_v7  ;;  %v615_v14 = vld [vmem:[%s516_s9] sm:$0xff]  ;;  %v790_v18 = vld [vmem:[#allocation14 + $0x10] sm:$0xff]  ;;  %s2537_s25 = smov 104   ;;  %s3200_s20 = sld [smem:[#allocation37_spill]]  ;;  %vm1211_vm7 = vcmask 130112  }
 0x115   : > { %2019 = vmatpush3.bf16.msra.mxu0 %v2018_v5  ;;  %v2027_v13 = vpack.c.bf16 %v706_v11, %v705_v10  ;;  %v702_v15 = vld [vmem:[%s525_s1] sm:$0xff]  ;;  %v788_v16 = vld [vmem:[#allocation14] sm:$0xff]  ;;  %v789_v17 = vld [vmem:[#allocation14 + $0x8] sm:$0xff]  ;;  %s2538_s21 = smov 8   ;;  %s2539_s16 = smov 16   ;;  %vm1385_vm8 = vcmask 195712  }
 0x116   : > { %2025 = vmatpush3.bf16.msra.mxu1 %v2024_v9  ;;  %2020 = vmatprep.subr.bf16.mxu0 %v2532_v0  ;;  %v2030_v19 = vpack.c.bf16 %v789_v17, %v788_v16  ;;  %v791_v20 = vld [vmem:[#allocation14 + $0x18] sm:$0xff]  ;;  %v787_v22 = vld [vmem:[%s534_s5] sm:$0xff]  ;;  %s3201_s9 = sld [smem:[#allocation26_spill]]  ;;  %s2540_s13 = smov 24   ;;  %vm1559_vm9 = vcmask 261312  }
 0x117   : > { %2026 = vmatprep.subr.bf16.mxu1 %v2532_v0  ;;  %v2033_v21 = vpack.c.bf16 %v791_v20, %v790_v18  ;;  %v872_v41 = vld [vmem:[%s543_s11] sm:$0xff]  ;;  %s3202_s30 = sld [smem:[#allocation30_spill]]  ;;  %s614_s27 = scalar_lea.vmem [#allocation17], %s2937_s28 }
 0x118   : > { %v1873_v23 = vld [vmem:[%s3198_s19] ss:$0 sm:$0xff]  ;;  %s3203_s18 = sld [smem:[#allocation38_spill]]  ;;  %s1662_s29 = sshll.u32 %s614_s27, 4  ;;  %s3070_s29 = int_to_ptr.vmem [resolvable:$true] %s1662_s29 }
 0x119   : > { %2022 = vmatpush3.bf16.msra.mxu0 %v2021_v12  ;;  %v1875_v24 = vld [vmem:[%s3199_s12] ss:$0 sm:$0xff]  ;;  %s3204_s4 = sld [smem:[#allocation39_spill]]  ;;  %s2541_s28 = smov [#allocation17]  }
 0x11a   : > { %2028 = vmatpush3.bf16.msra.mxu1 %v2027_v13  ;;  %2029 = vmatprep.subr.bf16.mxu0 %v2532_v0  ;;  %v1877_v37 = vld [vmem:[%s3200_s20] ss:$0 sm:$0xff] }
 0x11b   : > { %1966 = vmatprep.subr.mxu1 %v2534_v1 }
 0x11c   : > { %1942 = vmatmul.mubr.msk.f32.vlgmr.msra.gmra.mrb[0].mxu0 %vm627_vm1, %v615_v14  ;;  %s1894_s11 = sshll.u32 %s3201_s9, 7 }
 0x11d   : > { %1953 = vmatmul.mubr.msk.f32.vlgmr.msra.gmra.mrb[0].mxu1 %vm627_vm1, %v702_v15  ;;  %1963 = vmatprep.mubr.msk.f32.mxu0 %vm2533_vm0, %v2534_v1  ;;  %p3205_p0 = scmp.ne.s32.totalorder %s3202_s30, 0 }
 0x11e   : > { %1968 = vmatprep.mubr.msk.f32.mxu1 %vm2533_vm0, %v2534_v1  ;;  %2031 = vmatpush3.bf16.msra.mxu0 %v2030_v19 }
 0x11f   : > { %2032 = vmatprep.subr.bf16.mxu0 %v2532_v0  ;;  %s3068_s12 = scalar_lea.hbm %s3204_s4, %s1894_s11 }
 0x122   : > { %2034 = vmatpush3.bf16.msra.mxu0 %v2033_v21 }
 0x123   : > { %1986 = vmatprep.subr.mxu0 %v2534_v1 }
 0x125   : > { %1964 = vmatmul.mubr.msk.f32.vlgmr.msra.gmra.mrb[2].mxu0 %vm627_vm1, %v787_v22 }
 0x126   : > { %1988 = vmatprep.mubr.msk.f32.mxu0 %vm2533_vm0, %v2534_v1 }
 0x1ef   : > { %v697_v25 = vpop.f32.mrb[0].mxu0 }
 0x1f0   : > { %v698_v26 = vadd.f32 %v1873_v23, %v697_v25  ;;  %v783_v27 = vpop.f32.mrb[0].mxu1  ;;  %v1943_v28 = vpop.f32.mrb[1].mxu0 }
 0x1f1   : > { %v784_v29 = vadd.f32 %v1875_v24, %v783_v27  ;;  %v1954_v30 = vpop.f32.mrb[1].mxu1 }
 0x1f2   : > { %v701_v31 = vmul.f32 0.35355338, %v698_v26 }
 0x1f3   : > { %1967 = vmatpush3.xpose.msk.msra.mxu1 %vm873_vm2, %v784_v29 }
 0x1f4   : > { %1038 = vrot.lane.b32.xlu1 %v701_v31, %s2535_s15  ;;  %1971 = vmatprep.subr.mxu1 %v2534_v1 }
 0x1f6   : > { %1969 = vmatmul.mubr.msk.f32.vlgmr.msra.gmra.mrb[2].mxu1 %vm873_vm2, %v701_v31 }
 0x1f7   : > { %1973 = vmatprep.mubr.msk.f32.mxu1 %vm2533_vm0, %v2534_v1 }
 0x1f8   : > { %1215 = vrot.lane.b32.xlu1 %v784_v29, %s2536_s17  ;;  %v868_v38 = vpop.f32.mrb[2].mxu0 }
 0x1f9   : > { %v869_v39 = vadd.f32 %v1877_v37, %v868_v38  ;;  %v1965_v40 = vpop.f32.mrb[3].mxu0 }
 0x1fb   : > { %1972 = vmatpush3.msra.mxu1 %v869_v39 }
 0x1fc   : > { %1213 = vrot.lane.b32.xlu1 %v701_v31, %s2536_s17  ;;  %1976 = vmatprep.subr.mxu1 %v2534_v1 }
 0x200   : > { %1389 = vrot.lane.b32.xlu1 %v784_v29, %s2537_s25 }
 0x204   : > { %1387 = vrot.lane.b32.xlu1 %v701_v31, %s2537_s25 }
 0x266   : > { %v1039_v32 = vpop.permute.xlu1 %1038 }
 0x26a   : > { %v1216_v33 = vpop.permute.xlu1 %1215 }
 0x26b   : > { %1987 = vmatpush3.xpose.msk.msra.mxu0 %vm873_vm2, %v1216_v33  ;;  %v1563_v33 = vld [vmem:[#allocation15 + $0x8] sm:$0xff] }
 0x26c   : > { %1996 = vmatprep.subr.mxu0 %v2534_v1 }
 0x26e   : > { %v1214_v34 = vpop.permute.xlu1 %1213 }
 0x26f   : > { %1989 = vmatmul.mubr.msk.f32.vlgmr.msra.gmra.mrb[4].mxu0 %vm873_vm2, %v1214_v34  ;;  %v1564_v34 = vld [vmem:[#allocation15 + $0x10] sm:$0xff] }
 0x270   : > { %1998 = vmatprep.mubr.msk.f32.mxu0 %vm2533_vm0, %v2534_v1 }
 0x272   : > { %v1390_v35 = vpop.permute.xlu1 %1389 }
 0x273   : > { %1997 = vmatpush3.xpose.msk.msra.mxu0 %vm873_vm2, %v1390_v35  ;;  %v1565_v35 = vld [vmem:[#allocation15 + $0x18] sm:$0xff] }
 0x274   : > { %2035 = vmatprep.subr.bf16.mxu0 %v2532_v0  ;;  %v2039_v38 = vpack.c.bf16 %v1565_v35, %v1564_v34 }
 0x276   : > { %v1388_v36 = vpop.permute.xlu1 %1387 }
 0x277   : > { %1999 = vmatmul.mubr.msk.f32.vlgmr.msra.gmra.mrb[6].mxu0 %vm873_vm2, %v1388_v36 }
 0x278   : > { %2014 = vmatprep.mubr.msk.f32.mxu0 %vm2533_vm0, %v2534_v1 }
 0x2c9   : > { %v946_v42 = vpop.f32.mrb[2].mxu1 }
 0x2ca   : > { %v947_v43 = vadd.f32 %v946_v42, %v872_v41  ;;  %v1970_v44 = vpop.f32.mrb[3].mxu1 }
 0x2cc   : > { %v950_v45 = vsel %vm873_vm2, %v947_v43, -inf }
 0x2cd   : > { %951 = vmax.xlane.f32.xlu0 %v950_v45 }
 0x2e3   : > { %1040 = vrot.lane.b32.xlu0 %v784_v29, %s2535_s15 }
 0x342   : > { %v1287_v46 = vpop.f32.mrb[4].mxu0 }
 0x343   : > { %v1288_v47 = vadd.f32 %v1287_v46, %v872_v41  ;;  %v1990_v48 = vpop.f32.mrb[5].mxu0 }
 0x345   : > { %v1291_v49 = vsel %vm873_vm2, %v1288_v47, -inf }
 0x346   : > { %1292 = vmax.xlane.f32.xlu0 %v1291_v49 }
 0x34a   : > { %v1461_v50 = vpop.f32.mrb[6].mxu0 }
 0x34b   : > { %v1462_v51 = vadd.f32 %v1461_v50, %v872_v41  ;;  %v2000_v52 = vpop.f32.mrb[7].mxu0 }
 0x34c   : > { %v1891_v52 = vld [vmem:[%s3203_s18] ss:$0 sm:$0xff] }
 0x34d   : > { %v1465_v53 = vsel %vm873_vm2, %v1462_v51, -inf }
 0x34e   : > { %1466 = vmax.xlane.f32.xlu1 %v1465_v53 }
 0x35a   : > { %v952_v54 = vpop.xlane.xlu0 %951 }
 0x35b   : > { %vm953_vm3 = vcmp.eq.f32.partialorder %v952_v54, -inf }
 0x35c   : > { %v954_v55 = vsel %vm953_vm3, 0.0, %v952_v54  ;;  %1128 = vrot.lane.b32.xlu0 %v869_v39, %s2535_s15  ;;  %s1648_s15 = scalar_lea.sflag [#allocation5], %s2934_s24 }
 0x35d   : > { %v955_v56 = vsub.f32 %v947_v43, %v954_v55 }
 0x35e   : > { %v1041_v59 = vpop.permute.xlu0 %1040 }
 0x35f   : > { %v956_v57 = vmul.f32 1.442695, %v955_v56 }
 0x361   : > { %2170 = vpow2.f32 %v956_v57 }
 0x36b   : > { %v2171_v58 = vpop.eup %2170 }
 0x36c   : > { %1974 = vmatmul.mubr.msk.f32.vlgmr.msra.gmra.mrb[4].mxu1 %vm873_vm2, %v2171_v58  ;;  %v958_v25 = vsel %vm873_vm2, %v2171_v58, 0.0 }
 0x36d   : > { %1977 = vmatpush3.xpose.msk.msra.mxu1 %vm873_vm2, %v1041_v59  ;;  %1978 = vmatprep.mubr.msk.f32.mxu1 %vm2533_vm0, %v2534_v1 }
 0x36e   : > { %1981 = vmatprep.subr.mxu1 %v2534_v1 }
 0x370   : > { %1979 = vmatmul.mubr.msk.f32.vlgmr.msra.gmra.mrb[6].mxu1 %vm873_vm2, %v1039_v32  ;;  %v1562_v32 = vld [vmem:[#allocation15] sm:$0xff] }
 0x371   : > { %1983 = vmatprep.mubr.msk.f32.mxu1 %vm2533_vm0, %v2534_v1 }
 0x3d3   : > { %v1293_v60 = vpop.xlane.xlu0 %1292 }
 0x3d4   : > { %vm1294_vm4 = vcmp.eq.f32.partialorder %v1293_v60, -inf }
 0x3d5   : > { %v1295_v6 = vsel %vm1294_vm4, 0.0, %v1293_v60 }
 0x3d6   : > { %v1296_v7 = vsub.f32 %v1288_v47, %v1295_v6 }
 0x3d7   : > { %v1129_v61 = vpop.permute.xlu0 %1128 }
 0x3d8   : > { %1982 = vmatpush3.msra.mxu1 %v1129_v61  ;;  %v1297_v8 = vmul.f32 1.442695, %v1296_v7 }
 0x3d9   : > { %1991 = vmatprep.subr.mxu1 %v2534_v1 }
 0x3da   : > { %2172 = vpow2.f32 %v1297_v8 }
 0x3db   : > { %v1467_v11 = vpop.xlane.xlu1 %1466 }
 0x3dc   : > { %vm1468_vm5 = vcmp.eq.f32.partialorder %v1467_v11, -inf }
 0x3dd   : > { %v1469_v12 = vsel %vm1468_vm5, 0.0, %v1467_v11 }
 0x3de   : > { %v1470_v14 = vsub.f32 %v1462_v51, %v1469_v12 }
 0x3e0   : > { %v1471_v17 = vmul.f32 1.442695, %v1470_v14 }
 0x3e4   : > { %v2173_v9 = vpop.eup %2172 }
 0x3e5   : > { %v1299_v10 = vsel %vm873_vm2, %v2173_v9, 0.0 }
 0x43f   : > { %v1030_v62 = vpop.f32.mrb[4].mxu1 }
 0x440   : > { %v1975_v63 = vpop.f32.mrb[5].mxu1 }
 0x443   : > { %v1112_v2 = vpop.f32.mrb[6].mxu1 }
 0x444   : > { %v1113_v3 = vadd.f32 %v1112_v2, %v872_v41  ;;  %v1980_v4 = vpop.f32.mrb[7].mxu1 }
 0x446   : > { %v1116_v5 = vsel %vm873_vm2, %v1113_v3, -inf }
 0x447   : > { %1117 = vmax.xlane.f32.xlu1 %v1116_v5 }
 0x458   : > { %1302 = vrot.lane.b32.xlu1 %v869_v39, %s2536_s17  ;;  %s2418_s17 = scalar_lea.vmem %s3070_s29, 128 }
 0x459   : > { %p2419_p3 = scmp.ne.s32.totalorder %s3070_s29, %s2418_s17 }
 0x45b   : > { %p2420_p12 = pnand %p2419_p3, %p3205_p0 }
 0x45c   : > { %1476 = vrot.lane.b32.xlu1 %v869_v39, %s2537_s25  ;;  %s2422_s25 = sshll.u32 %s2541_s28, 4  ;;  %s2423_s25 = int_to_ptr.vmem [resolvable:$false] %s2422_s25 }
 0x45d   : > { %p2421_p9 = pneg %p2420_p12  ;;  %s2424_s14 = scalar_lea.vmem %s2423_s25, 256 }
 0x45e   : > { %p2425_p5 = scmp.lt.s32.totalorder %s3070_s29, %s2423_s25  ;;  %p2426_p7 = scmp.lt.s32.totalorder %s2424_s14, %s2418_s17 }
 0x460   : > { %p2427_p10 = por %p2426_p7, %p2425_p5 }
 0x462   : > { %p2428_p6 = pnand %p2427_p10, %p2421_p9 }
 0x480   : > { %1300 = vadd.xlane.f32.xlu1 %v1299_v10 }
 0x4d4   : > { %v1118_v13 = vpop.xlane.xlu1 %1117 }
 0x4d5   : > { %vm1119_vm6 = vcmp.eq.f32.partialorder %v1118_v13, -inf }
 0x4d6   : > { %v1120_v15 = vsel %vm1119_vm6, 0.0, %v1118_v13 }
 0x4d7   : > { %v1121_v16 = vsub.f32 %v1113_v3, %v1120_v15 }
 0x4d8   : > { %v1303_v19 = vpop.permute.xlu1 %1302 }
 0x4d9   : > { %v1122_v18 = vmul.f32 1.442695, %v1121_v16 }
 0x4db   : > { %2174 = vpow2.f32 %v1122_v18 }
 0x4dc   : > { %2176 = vpow2.f32 %v1471_v17  ;;  %v1477_v23 = vpop.permute.xlu1 %1476 }
 0x4e5   : > { %v2175_v20 = vpop.eup %2174 }
 0x4e6   : > { %1984 = vmatmul.mubr.msk.f32.vlgmr.msra.gmra.mrb[8].mxu1 %vm873_vm2, %v2175_v20  ;;  %v1124_v21 = vsel %vm873_vm2, %v2175_v20, 0.0  ;;  %v2177_v22 = vpop.eup %2176 }
 0x4e7   : > { %1992 = vmatpush3.msra.mxu1 %v1303_v19  ;;  %1125 = vadd.xlane.f32.xlu0 %v1124_v21  ;;  %v1473_v24 = vsel %vm873_vm2, %v2177_v22, 0.0 }
 0x4e8   : > { %1993 = vmatprep.mubr.msk.f32.mxu1 %vm2533_vm0, %v2534_v1  ;;  %2001 = vmatprep.subr.mxu1 %v2534_v1 }
 0x4ea   : > { %1994 = vmatmul.mubr.msk.f32.vlgmr.msra.gmra.mrb[10].mxu1 %vm873_vm2, %v2173_v9 }
 0x4eb   : > { %2002 = vmatpush3.msra.mxu1 %v1477_v23  ;;  %1474 = vadd.xlane.f32.xlu0 %v1473_v24 }
 0x4ec   : > { %2003 = vmatprep.mubr.msk.f32.mxu1 %vm2533_vm0, %v2534_v1  ;;  %v2036_v1 = vpack.c.bf16 %v1563_v33, %v1562_v32 }
 0x4ee   : > { %2004 = vmatmul.mubr.msk.f32.vlgmr.msra.gmra.mrb[12].mxu1 %vm873_vm2, %v2177_v22  ;;  %2037 = vmatpush3.bf16.msra.mxu0 %v2036_v1 }
 0x4ef   : > { %959 = vadd.xlane.f32.xlu0 %v958_v25  ;;  %2038 = vmatprep.subr.bf16.mxu0 %v2532_v0 }
 0x4f2   : > { %2040 = vmatpush3.bf16.msra.mxu0 %v2039_v38 }
 0x50d   : > { %v1301_v31 = vpop.xlane.xlu1 %1300 }
 0x574   : > { %v1126_v26 = vpop.xlane.xlu0 %1125 }
 0x578   : > { %v1475_v27 = vpop.xlane.xlu0 %1474 }
 0x57c   : > { %v960_v28 = vpop.xlane.xlu0 %959 }
 0x57d   : > { %2178 = vrcp.f32 %v960_v28 }
 0x57e   : > { %2180 = vrcp.f32 %v1126_v26 }
 0x57f   : > { %2182 = vrcp.f32 %v1301_v31 }
 0x580   : > { %2184 = vrcp.f32 %v1475_v27 }
 0x587   : > { %v2179_v29 = vpop.eup %2178 }
 0x588   : > { %v1036_v30 = vmul.f32 %v2179_v29, %v1030_v62  ;;  %v2181_v36 = vpop.eup %2180 }
 0x589   : > { %v2183_v41 = vpop.eup %2182 }
 0x58a   : > { %1037 = vst.msk [vmem:[#allocation2] sm:$0xff] %vm873_vm2, %v1036_v30  ;;  %v2185_v45 = vpop.eup %2184 }
 0x5b9   : > { %v1200_v37 = vpop.f32.mrb[8].mxu1 }
 0x5ba   : > { %v1206_v39 = vmul.f32 %v2181_v36, %v1200_v37  ;;  %v1985_v40 = vpop.f32.mrb[9].mxu1 }
 0x5bc   : > { %1208 = vrot.lane.b32.xlu1 %v1206_v39, %s2538_s21 }
 0x5bd   : > { %v1374_v42 = vpop.f32.mrb[10].mxu1 }
 0x5be   : > { %v1380_v43 = vmul.f32 %v2183_v41, %v1374_v42  ;;  %v1995_v44 = vpop.f32.mrb[11].mxu1 }
 0x5c0   : > { %1382 = vrot.lane.b32.xlu0 %v1380_v43, %s2539_s16 }
 0x5c1   : > { %v1548_v46 = vpop.f32.mrb[12].mxu1 }
 0x5c2   : > { %v1554_v47 = vmul.f32 %v2185_v45, %v1548_v46  ;;  %v2005_v48 = vpop.f32.mrb[13].mxu1 }
 0x5c4   : > { %1556 = vrot.lane.b32.xlu1 %v1554_v47, %s2540_s13 }
 0x62e   : > { %v1209_v49 = vpop.permute.xlu1 %1208 }
 0x62f   : > { %1212 = vst.msk [vmem:[#allocation2] sm:$0xff] %vm1211_vm7, %v1209_v49 }
 0x632   : > { %v1383_v0 = vpop.permute.xlu0 %1382 }
 0x633   : > { %1386 = vst.msk [vmem:[#allocation2] sm:$0xff] %vm1385_vm8, %v1383_v0 }
 0x636   : > { %v1557_v50 = vpop.permute.xlu1 %1556 }
 0x637   : > { %1560 = vst.msk [vmem:[#allocation2] sm:$0xff] %vm1559_vm9, %v1557_v50 }
 0x63e   : > { %v1561_v51 = vld [vmem:[#allocation2] sm:$0xff] }
 0x63f   : > { %2015 = vmatmul.mubr.msk.f32.vlgmr.msra.gmra.mrb[8].mxu0 %vm627_vm1, %v1561_v51 }
 0x712   : > { %v1642_v53 = vpop.f32.mrb[8].mxu0 }
 0x713   : > { %v1643_v54 = vadd.f32 %v1891_v52, %v1642_v53  ;;  %v2016_v55 = vpop.f32.mrb[9].mxu0 }
 0x715   : > { %1646 = vst.msk [vmem:[%s614_s27] sm:$0xff] %vm627_vm1, %v1643_v54 }
 0x716   : > { %2431 = shalt.err (!%p2428_p6)
}
 0x717   : > { %s2432_s24 = scalar_lea.hbm %s3068_s12, 128  ;;  %s2436_s21 = scalar_lea.hbm %s3204_s4, 256 }
 0x718   : > { %p2433_p2 = scmp.ne.s32.totalorder %s3068_s12, %s2432_s24  ;;  %p2437_p1 = scmp.lt.u32.totalorder %s3068_s12, %s3204_s4 }
 0x719   : > { %p2438_p4 = scmp.lt.u32.totalorder %s2436_s21, %s2432_s24  ;;  %p2440_p3 = scmp.lt.u32.totalorder %s2432_s24, %s3068_s12 }
 0x71a   : > { %p2434_p11 = pnand %p2433_p2, %p3205_p0 }
 0x71b   : > { %p2439_p13 = por %p2438_p4, %p2437_p1 }
 0x71c   : > { %p2435_p8 = pneg %p2434_p11 }
 0x71d   : > { %p2441_p12 = por %p2440_p3, %p2439_p13 }
 0x71f   : > { %p2442_p9 = pnand %p2441_p12, %p2435_p8 }
 0x721   : > { %2445 = shalt.err (!%p2442_p9)
}
 0x722   : > { %2065 = dma.vmem_to_hbm [thread:$0]  (%p3205_p0), %s3070_s29, 128, %s3068_s12, %s1648_s15  }
 0x723 PF: > { %s3206_s13 = sld [smem:[#allocation25_spill]]  ;;  %s3207_s1 = sld [smem:[#allocation28_spill]] }
 0x724   : > { %p3209_p7 = scmp.ge.s32.totalorder %s2520_s26, 2 }
 0x729   : > { %s1674_s5 = sand.u32 1, %s3206_s13   ;;  %p3208_p5 = scmp.ne.s32.totalorder %s3207_s1, 0 }
 0x72a   : > { %s1675_s18 = scalar_lea.sflag [#allocation5], %s1674_s5 }
 0x72b   : > { %p2094_p10 = pnand %p3209_p7, %p3208_p5 }
 0x72d   : > { %2495 = dma.done.wait (!%p2094_p10), %s1675_s18, 128  }
 0x72e   : > { %2497 = vsyncadd (!%p2094_p10), %s1675_s18, 4294967168  ;;  %s36_s26 = sadd.s32 1, %s2520_s26   ;;  %s3210_s30 = sld [smem:[#allocation31_spill]] }
 0x72f   : > { %p33_p6 = scmp.ge.s32.totalorder %s36_s26, 4   ;;  %s3211_s24 = sld [smem:[#allocation27_spill]] }
 0x730   : > { %s3212_s25 = sld [smem:[#allocation29_spill]]  ;;  %s3213_s21 = smov %s2504_s22 }
 0x731   : > { %s3214_s22 = smov %s2508_s23  ;;  %35 = sbr.rel (!%p33_p6) target bundleno = 21 (0x15), region = 166 }
 0x734   : > { %s3215_s23 = smov %s3210_s30 }
 0x738   :  { %1680 = vsyncpa [#allocation4], 1 }
 0x739   :  { %1682 = vsyncpa [#allocation4 + $0x1], 1 }
 0x73a   :  { %1683 = vsyncpa [#allocation7], 1 }
 0x73b   :  { %1685 = vsyncpa [#allocation7 + $0x1], 1 }
 0x73c   :  { %1686 = vsyncpa [#allocation10], 1 }
 0x73d   :  { %1688 = vsyncpa [#allocation10 + $0x1], 1 }
 0x73e   :  { %1689 = vsyncpa [#allocation13], 1 }
 0x73f   :  { %1690 = vsyncpa [#allocation16], 1 }
 0x740   :  { %1691 = vsyncpa [#allocation5], 1 }
 0x741   :  { %1693 = vsyncpa [#allocation5 + $0x1], 1 }

</bundles_post_ra>
